<compile_context>
chip_gen: v5e
topology: v5e:2x2
jax: 0.10.0
libtpu: 0.0.40
codegen_flags: <defaults>
</compile_context>

<pallas_src>
import math

import jax
import jax.numpy as jnp
from jax.experimental import pallas as pl
from jax.experimental.pallas import tpu as pltpu

# ---- small synthetic "TinyBERT" config (real one: 4L / 312 hidden) ----
VOCAB = 100
HIDDEN = 32
N_LAYERS = 2
N_HEADS = 4
HEAD_DIM = HIDDEN // N_HEADS
INTER = 64
MAX_POS = 16
ATT_POOL = 128        # fixed by the module: nn.Linear(hidden_size, 128)
LN_EPS = 1e-12        # BERT LayerNorm eps
NEG_INF = -1e9


# ----------------------------- in-kernel helpers -----------------------------
def _layernorm(x, g, b, eps=LN_EPS):
    mu = jnp.mean(x, axis=-1, keepdims=True)
    var = jnp.mean((x - mu) ** 2, axis=-1, keepdims=True)
    return (x - mu) * jax.lax.rsqrt(var + eps) * g + b


def _gelu(x):
    # exact (erf-based) GELU, matching HF BERT's "gelu"
    return 0.5 * x * (1.0 + jax.lax.erf(x * 0.7071067811865475))


def _mm(a, b):
    """a @ b on the MXU with bf16 operands, f32 accumulation."""
    return jax.lax.dot_general(
        a.astype(jnp.bfloat16), b.astype(jnp.bfloat16),
        (((1,), (0,)), ((), ())), preferred_element_type=jnp.float32)


def _mm_nt(a, b):
    """a @ b.T (contract last dims) without materializing a transpose."""
    return jax.lax.dot_general(
        a.astype(jnp.bfloat16), b.astype(jnp.bfloat16),
        (((1,), (1,)), ((), ())), preferred_element_type=jnp.float32)


# ----------------------------- fused Pallas kernel ---------------------------
def fused_forward_kernel(emb_ref, bias_ref, mask_ref,
                         eg_ref, eb_ref,
                         wqkv_ref, bqkv_ref, wo_ref, bo_ref,
                         ln1g_ref, ln1b_ref,
                         w1_ref, b1_ref, w2_ref, b2_ref,
                         ln2g_ref, ln2b_ref,
                         wa1_ref, ba1_ref, wa2_ref, ba2_ref,
                         wr_ref, br_ref,
                         o_ref):
    B = o_ref.shape[0]
    BS, H = emb_ref.shape
    S = BS // B
    scale = 1.0 / math.sqrt(HEAD_DIM)

    bias = bias_ref[...]                                        # (BS, BS)
    x = _layernorm(emb_ref[...], eg_ref[...], eb_ref[...])      # (BS, H) f32

    n_layers = wqkv_ref.shape[0]
    for l in range(n_layers):                                   # static unroll
        qkv = _mm(x, wqkv_ref[l]) + bqkv_ref[l]                 # (BS, 3H)
        wo_l = wo_ref[l]                                        # (H, H) f32
        attn = jnp.zeros((BS, H), jnp.float32)
        for h in range(N_HEADS):                                # static unroll
            lo, hi = h * HEAD_DIM, (h + 1) * HEAD_DIM
            qh = qkv[:, lo:hi]
            kh = qkv[:, H + lo:H + hi]
            vh = qkv[:, 2 * H + lo:2 * H + hi]
            sc = _mm_nt(qh, kh) * scale + bias                  # (BS, BS)
            sc = sc - jnp.max(sc, axis=-1, keepdims=True)
            p = jnp.exp(sc)
            p = p * pl.reciprocal(jnp.sum(p, axis=-1, keepdims=True), approx=True)
            ctx = _mm(p, vh)                                    # (BS, HEAD_DIM)
            attn = attn + _mm(ctx, wo_l[lo:hi, :])              # accumulate per head
        x = _layernorm(x + attn + bo_ref[l], ln1g_ref[l], ln1b_ref[l])
        hmid = _gelu(_mm(x, w1_ref[l]) + b1_ref[l])             # (BS, INTER)
        ffn = _mm(hmid, w2_ref[l]) + b2_ref[l]
        x = _layernorm(x + ffn, ln2g_ref[l], ln2b_ref[l])

    # attention pooling: Linear(H,128) -> Tanh -> Linear(128,1)  (VPU path for N=1)
    a = jnp.tanh(_mm(x, wa1_ref[...]) + ba1_ref[...])                          # (BS, 128)
    logits = jnp.sum(a * wa2_ref[...], axis=-1, keepdims=True) + ba2_ref[...]  # (BS, 1)
    logits = jnp.where(mask_ref[...] > 0.0, logits, NEG_INF)

    lg = logits.reshape(B, S, 1)
    h3 = x.reshape(B, S, H)
    mx = jnp.max(lg, axis=1, keepdims=True)
    e = jnp.exp(lg - mx)
    w = e * pl.reciprocal(jnp.sum(e, axis=1, keepdims=True), approx=True)      # (B, S, 1)
    pooled = jnp.sum(h3 * w, axis=1)                                           # (B, H)
    score = jnp.tanh(jnp.sum(pooled * wr_ref[...], axis=-1, keepdims=True)
                     + br_ref[...])                                            # (B, 1)
    o_ref[...] = score


# ------------------------------ wrappers -------------------------------------
def init_params(key):
    keys = iter(jax.random.split(key, 64))

    def dense(shape):
        return jax.random.normal(next(keys), shape, jnp.float32) * 0.02

    params = {
        "word_emb": dense((VOCAB, HIDDEN)),
        "pos_emb": dense((MAX_POS, HIDDEN)),
        "type_emb": dense((2, HIDDEN)),
        "emb_ln_g": jnp.ones((1, HIDDEN), jnp.float32),
        "emb_ln_b": jnp.zeros((1, HIDDEN), jnp.float32),
        "layers": [],
        # pooling-attention head + regressor
        "wa1": dense((HIDDEN, ATT_POOL)),
        "ba1": jnp.zeros((1, ATT_POOL), jnp.float32),
        "wa2": dense((ATT_POOL, 1)),
        "ba2": jnp.zeros((1, 1), jnp.float32),
        "wr": dense((HIDDEN, 1)),
        "br": jnp.zeros((1, 1), jnp.float32),
    }
    for _ in range(N_LAYERS):
        params["layers"].append({
            "wq": dense((HIDDEN, HIDDEN)), "bq": jnp.zeros((1, HIDDEN), jnp.float32),
            "wk": dense((HIDDEN, HIDDEN)), "bk": jnp.zeros((1, HIDDEN), jnp.float32),
            "wv": dense((HIDDEN, HIDDEN)), "bv": jnp.zeros((1, HIDDEN), jnp.float32),
            "wo": dense((HIDDEN, HIDDEN)), "bo": jnp.zeros((1, HIDDEN), jnp.float32),
            "ln1_g": jnp.ones((1, HIDDEN), jnp.float32),
            "ln1_b": jnp.zeros((1, HIDDEN), jnp.float32),
            "w1": dense((HIDDEN, INTER)), "b1": jnp.zeros((1, INTER), jnp.float32),
            "w2": dense((INTER, HIDDEN)), "b2": jnp.zeros((1, HIDDEN), jnp.float32),
            "ln2_g": jnp.ones((1, HIDDEN), jnp.float32),
            "ln2_b": jnp.zeros((1, HIDDEN), jnp.float32),
        })
    return params


def pack_params(params):
    """One-time host-side weight prep: stack layers, fuse QKV, bf16 matmul weights."""
    def stack(name, dtype=jnp.float32):
        return jnp.stack([ly[name] for ly in params["layers"]]).astype(dtype)

    return {
        "word_emb": params["word_emb"],
        "pos_emb": params["pos_emb"],
        "type_emb": params["type_emb"],
        "emb_ln_g": params["emb_ln_g"],
        "emb_ln_b": params["emb_ln_b"],
        # fused QKV: (L, H, 3H) bf16 weight + (L, 1, 3H) f32 bias
        "wqkv": jnp.stack([jnp.concatenate([ly["wq"], ly["wk"], ly["wv"]], axis=1)
                           for ly in params["layers"]]).astype(jnp.bfloat16),
        "bqkv": jnp.stack([jnp.concatenate([ly["bq"], ly["bk"], ly["bv"]], axis=1)
                           for ly in params["layers"]]),
        "wo": stack("wo"),                      # f32: row-sliced per head in-kernel
        "bo": stack("bo"),
        "ln1_g": stack("ln1_g"), "ln1_b": stack("ln1_b"),
        "w1": stack("w1", jnp.bfloat16), "b1": stack("b1"),
        "w2": stack("w2", jnp.bfloat16), "b2": stack("b2"),
        "ln2_g": stack("ln2_g"), "ln2_b": stack("ln2_b"),
        "wa1": params["wa1"].astype(jnp.bfloat16),
        "ba1": params["ba1"],
        "wa2": params["wa2"].reshape(1, ATT_POOL),   # row vector for VPU path
        "ba2": params["ba2"],
        "wr": params["wr"].reshape(1, HIDDEN),       # row vector for VPU path
        "br": params["br"],
    }


def forward(packed, input_ids, attention_mask, labels=None):
    B, S = input_ids.shape
    # TODO(synk): data-dependent embedding gather stays in plain JAX glue.
    emb = (jnp.take(packed["word_emb"], input_ids, axis=0)
           + packed["pos_emb"][None, :S, :]
           + packed["type_emb"][0][None, None, :])
    emb2 = emb.reshape(B * S, HIDDEN).astype(jnp.float32)

    maskf = attention_mask.astype(jnp.float32)               # (B, S)
    mask_col = maskf.reshape(B * S, 1)
    # Block-diagonal additive attention bias over the flattened (B*S) axis:
    # same-batch valid keys -> 0, padded keys / cross-batch pairs -> -1e9.
    batch_ids = jnp.repeat(jnp.arange(B), S)
    same_batch = batch_ids[:, None] == batch_ids[None, :]
    key_valid = maskf.reshape(B * S) > 0.0
    attn_bias = jnp.where(same_batch & key_valid[None, :], 0.0, NEG_INF
                          ).astype(jnp.float32)              # (B*S, B*S)

    score = pl.pallas_call(
        fused_forward_kernel,
        out_shape=jax.ShapeDtypeStruct((B, 1), jnp.float32),
        compiler_params=pltpu.CompilerParams(vmem_limit_bytes=64 * 1024 * 1024),
    )(emb2, attn_bias, mask_col,
      packed["emb_ln_g"], packed["emb_ln_b"],
      packed["wqkv"], packed["bqkv"], packed["wo"], packed["bo"],
      packed["ln1_g"], packed["ln1_b"],
      packed["w1"], packed["b1"], packed["w2"], packed["b2"],
      packed["ln2_g"], packed["ln2_b"],
      packed["wa1"], packed["ba1"], packed["wa2"], packed["ba2"],
      packed["wr"], packed["br"])

    score = score[:, 0]    # torch .squeeze(); note: for B==1 torch also drops batch
    loss = jnp.mean((score - labels) ** 2) if labels is not None else None
    return {"loss": loss, "score": score}


if __name__ == "__main__":
    key = jax.random.PRNGKey(0)
    pkey, ikey = jax.random.split(key)
    params = init_params(pkey)
    packed = pack_params(params)

    B, S = 2, 8
    input_ids = jax.random.randint(ikey, (B, S), 0, VOCAB, dtype=jnp.int32)
    lengths = jnp.array([S, 5], dtype=jnp.int32)
    attention_mask = (jnp.arange(S)[None, :] < lengths[:, None]).astype(jnp.int32)

    out = forward(packed, input_ids, attention_mask)
    score = jax.block_until_ready(out["score"])
    assert score.shape == (B,)
    assert bool(jnp.all(jnp.isfinite(score)))
    print("KERNEL_OK")
</pallas_src>

<mosaic_0001>
module attributes {stable_mosaic.version = 11 : i64} {
  func.func @fused_forward_kernel(%arg0: memref<16x32xf32, #tpu.memory_space<vmem>>, %arg1: memref<16x16xf32, #tpu.memory_space<vmem>>, %arg2: memref<16x1xf32, #tpu.memory_space<vmem>>, %arg3: memref<1x32xf32, #tpu.memory_space<vmem>>, %arg4: memref<1x32xf32, #tpu.memory_space<vmem>>, %arg5: memref<2x32x96xbf16, #tpu.memory_space<vmem>>, %arg6: memref<2x1x96xf32, #tpu.memory_space<vmem>>, %arg7: memref<2x32x32xf32, #tpu.memory_space<vmem>>, %arg8: memref<2x1x32xf32, #tpu.memory_space<vmem>>, %arg9: memref<2x1x32xf32, #tpu.memory_space<vmem>>, %arg10: memref<2x1x32xf32, #tpu.memory_space<vmem>>, %arg11: memref<2x32x64xbf16, #tpu.memory_space<vmem>>, %arg12: memref<2x1x64xf32, #tpu.memory_space<vmem>>, %arg13: memref<2x64x32xbf16, #tpu.memory_space<vmem>>, %arg14: memref<2x1x32xf32, #tpu.memory_space<vmem>>, %arg15: memref<2x1x32xf32, #tpu.memory_space<vmem>>, %arg16: memref<2x1x32xf32, #tpu.memory_space<vmem>>, %arg17: memref<32x128xbf16, #tpu.memory_space<vmem>>, %arg18: memref<1x128xf32, #tpu.memory_space<vmem>>, %arg19: memref<1x128xf32, #tpu.memory_space<vmem>>, %arg20: memref<1x1xf32, #tpu.memory_space<vmem>>, %arg21: memref<1x32xf32, #tpu.memory_space<vmem>>, %arg22: memref<1x1xf32, #tpu.memory_space<vmem>>, %arg23: memref<2x1xf32, #tpu.memory_space<vmem>>) attributes {dimension_semantics = [], scalar_prefetch = 0 : i64, scratch_operands = 0 : i64, tpu.core_type = #tpu.core_type<tc>} {
    %c0 = arith.constant 0 : index
    %c0_0 = arith.constant 0 : index
    %0 = vector.load %arg1[%c0, %c0_0] : memref<16x16xf32, #tpu.memory_space<vmem>>, vector<16x16xf32>
    %c0_1 = arith.constant 0 : index
    %c0_2 = arith.constant 0 : index
    %1 = vector.load %arg0[%c0_1, %c0_2] : memref<16x32xf32, #tpu.memory_space<vmem>>, vector<16x32xf32>
    %c0_3 = arith.constant 0 : index
    %c0_4 = arith.constant 0 : index
    %2 = vector.load %arg3[%c0_3, %c0_4] : memref<1x32xf32, #tpu.memory_space<vmem>>, vector<1x32xf32>
    %c0_5 = arith.constant 0 : index
    %c0_6 = arith.constant 0 : index
    %3 = vector.load %arg4[%c0_5, %c0_6] : memref<1x32xf32, #tpu.memory_space<vmem>>, vector<1x32xf32>
    %cst = arith.constant dense<0.000000e+00> : vector<16xf32>
    %4 = vector.multi_reduction <add>, %1, %cst [1] : vector<16x32xf32> to vector<16xf32>
    %5 = vector.shape_cast %4 : vector<16xf32> to vector<16x1xf32>
    %cst_7 = arith.constant 3.200000e+01 : f32
    %6 = vector.broadcast %cst_7 : f32 to vector<16x1xf32>
    %7 = arith.divf %5, %6 : vector<16x1xf32>
    %8 = vector.broadcast %7 : vector<16x1xf32> to vector<16x32xf32>
    %9 = arith.subf %1, %8 : vector<16x32xf32>
    %10 = arith.mulf %9, %9 : vector<16x32xf32>
    %cst_8 = arith.constant dense<0.000000e+00> : vector<16xf32>
    %11 = vector.multi_reduction <add>, %10, %cst_8 [1] : vector<16x32xf32> to vector<16xf32>
    %12 = vector.shape_cast %11 : vector<16xf32> to vector<16x1xf32>
    %cst_9 = arith.constant 3.200000e+01 : f32
    %13 = vector.broadcast %cst_9 : f32 to vector<16x1xf32>
    %14 = arith.divf %12, %13 : vector<16x1xf32>
    %15 = vector.broadcast %7 : vector<16x1xf32> to vector<16x32xf32>
    %16 = arith.subf %1, %15 : vector<16x32xf32>
    %cst_10 = arith.constant 9.99999996E-13 : f32
    %17 = vector.broadcast %cst_10 : f32 to vector<16x1xf32>
    %18 = arith.addf %14, %17 : vector<16x1xf32>
    %19 = math.rsqrt %18 : vector<16x1xf32>
    %20 = vector.broadcast %19 : vector<16x1xf32> to vector<16x32xf32>
    %21 = arith.mulf %16, %20 : vector<16x32xf32>
    %22 = vector.broadcast %2 : vector<1x32xf32> to vector<16x32xf32>
    %23 = arith.mulf %21, %22 : vector<16x32xf32>
    %24 = vector.broadcast %3 : vector<1x32xf32> to vector<16x32xf32>
    %25 = arith.addf %23, %24 : vector<16x32xf32>
    %c0_11 = arith.constant 0 : index
    %c0_12 = arith.constant 0 : index
    %c0_13 = arith.constant 0 : index
    %26 = vector.load %arg5[%c0_11, %c0_12, %c0_13] : memref<2x32x96xbf16, #tpu.memory_space<vmem>>, vector<1x32x96xbf16>
    %27 = vector.shape_cast %26 : vector<1x32x96xbf16> to vector<32x96xbf16>
    %28 = arith.truncf %25 : vector<16x32xf32> to vector<16x32xbf16>
    %cst_14 = arith.constant dense<0.000000e+00> : vector<16x96xf32>
    %29 = tpu.matmul %28, %27, %cst_14 {dimension_numbers = #tpu.dot_dimension_numbers<[1], [0], [0], [1], [0, 0, 1, 1], [], []>} : vector<16x32xbf16>, vector<32x96xbf16>, vector<16x96xf32> -> vector<16x96xf32>
    %c0_15 = arith.constant 0 : index
    %c0_16 = arith.constant 0 : index
    %c0_17 = arith.constant 0 : index
    %30 = vector.load %arg6[%c0_15, %c0_16, %c0_17] : memref<2x1x96xf32, #tpu.memory_space<vmem>>, vector<1x1x96xf32>
    %31 = vector.shape_cast %30 : vector<1x1x96xf32> to vector<1x96xf32>
    %32 = vector.broadcast %31 : vector<1x96xf32> to vector<16x96xf32>
    %33 = arith.addf %29, %32 : vector<16x96xf32>
    %c0_18 = arith.constant 0 : index
    %c0_19 = arith.constant 0 : index
    %c0_20 = arith.constant 0 : index
    %34 = vector.load %arg7[%c0_18, %c0_19, %c0_20] : memref<2x32x32xf32, #tpu.memory_space<vmem>>, vector<1x32x32xf32>
    %35 = vector.shape_cast %34 : vector<1x32x32xf32> to vector<32x32xf32>
    %cst_21 = arith.constant 0.000000e+00 : f32
    %36 = vector.broadcast %cst_21 : f32 to vector<16x32xf32>
    %37 = vector.extract_strided_slice %33 {offsets = [0, 0], sizes = [16, 8], strides = [1, 1]} : vector<16x96xf32> to vector<16x8xf32>
    %38 = vector.extract_strided_slice %33 {offsets = [0, 32], sizes = [16, 8], strides = [1, 1]} : vector<16x96xf32> to vector<16x8xf32>
    %39 = vector.extract_strided_slice %33 {offsets = [0, 64], sizes = [16, 8], strides = [1, 1]} : vector<16x96xf32> to vector<16x8xf32>
    %40 = arith.truncf %37 : vector<16x8xf32> to vector<16x8xbf16>
    %41 = arith.truncf %38 : vector<16x8xf32> to vector<16x8xbf16>
    %cst_22 = arith.constant dense<0.000000e+00> : vector<16x16xf32>
    %42 = tpu.matmul %40, %41, %cst_22 {dimension_numbers = #tpu.dot_dimension_numbers<[1], [1], [0], [0], [0, 0, 1, 0], [], []>} : vector<16x8xbf16>, vector<16x8xbf16>, vector<16x16xf32> -> vector<16x16xf32>
    %cst_23 = arith.constant 0.353553385 : f32
    %43 = vector.broadcast %cst_23 : f32 to vector<16x16xf32>
    %44 = arith.mulf %42, %43 : vector<16x16xf32>
    %45 = arith.addf %44, %0 : vector<16x16xf32>
    %cst_24 = arith.constant dense<0xFF800000> : vector<16xf32>
    %46 = vector.multi_reduction <maximumf>, %45, %cst_24 [1] : vector<16x16xf32> to vector<16xf32>
    %47 = vector.shape_cast %46 : vector<16xf32> to vector<16x1xf32>
    %48 = vector.broadcast %47 : vector<16x1xf32> to vector<16x16xf32>
    %49 = arith.subf %45, %48 : vector<16x16xf32>
    %50 = math.exp %49 : vector<16x16xf32>
    %cst_25 = arith.constant dense<0.000000e+00> : vector<16xf32>
    %51 = vector.multi_reduction <add>, %50, %cst_25 [1] : vector<16x16xf32> to vector<16xf32>
    %52 = vector.shape_cast %51 : vector<16xf32> to vector<16x1xf32>
    %53 = tpu.reciprocal %52 {approx = true} : vector<16x1xf32> -> vector<16x1xf32>
    %54 = vector.broadcast %53 : vector<16x1xf32> to vector<16x16xf32>
    %55 = arith.mulf %50, %54 : vector<16x16xf32>
    %56 = arith.truncf %55 : vector<16x16xf32> to vector<16x16xbf16>
    %57 = arith.truncf %39 : vector<16x8xf32> to vector<16x8xbf16>
    %cst_26 = arith.constant dense<0.000000e+00> : vector<16x8xf32>
    %58 = tpu.matmul %56, %57, %cst_26 {dimension_numbers = #tpu.dot_dimension_numbers<[1], [0], [0], [1], [0, 0, 1, 1], [], []>} : vector<16x16xbf16>, vector<16x8xbf16>, vector<16x8xf32> -> vector<16x8xf32>
    %59 = vector.extract_strided_slice %35 {offsets = [0, 0], sizes = [8, 32], strides = [1, 1]} : vector<32x32xf32> to vector<8x32xf32>
    %60 = arith.truncf %58 : vector<16x8xf32> to vector<16x8xbf16>
    %61 = arith.truncf %59 : vector<8x32xf32> to vector<8x32xbf16>
    %cst_27 = arith.constant dense<0.000000e+00> : vector<16x32xf32>
    %62 = tpu.matmul %60, %61, %cst_27 {dimension_numbers = #tpu.dot_dimension_numbers<[1], [0], [0], [1], [0, 0, 1, 1], [], []>} : vector<16x8xbf16>, vector<8x32xbf16>, vector<16x32xf32> -> vector<16x32xf32>
    %63 = arith.addf %36, %62 : vector<16x32xf32>
    %64 = vector.extract_strided_slice %33 {offsets = [0, 8], sizes = [16, 8], strides = [1, 1]} : vector<16x96xf32> to vector<16x8xf32>
    %65 = vector.extract_strided_slice %33 {offsets = [0, 40], sizes = [16, 8], strides = [1, 1]} : vector<16x96xf32> to vector<16x8xf32>
    %66 = vector.extract_strided_slice %33 {offsets = [0, 72], sizes = [16, 8], strides = [1, 1]} : vector<16x96xf32> to vector<16x8xf32>
    %67 = arith.truncf %64 : vector<16x8xf32> to vector<16x8xbf16>
    %68 = arith.truncf %65 : vector<16x8xf32> to vector<16x8xbf16>
    %cst_28 = arith.constant dense<0.000000e+00> : vector<16x16xf32>
    %69 = tpu.matmul %67, %68, %cst_28 {dimension_numbers = #tpu.dot_dimension_numbers<[1], [1], [0], [0], [0, 0, 1, 0], [], []>} : vector<16x8xbf16>, vector<16x8xbf16>, vector<16x16xf32> -> vector<16x16xf32>
    %cst_29 = arith.constant 0.353553385 : f32
    %70 = vector.broadcast %cst_29 : f32 to vector<16x16xf32>
    %71 = arith.mulf %69, %70 : vector<16x16xf32>
    %72 = arith.addf %71, %0 : vector<16x16xf32>
    %cst_30 = arith.constant dense<0xFF800000> : vector<16xf32>
    %73 = vector.multi_reduction <maximumf>, %72, %cst_30 [1] : vector<16x16xf32> to vector<16xf32>
    %74 = vector.shape_cast %73 : vector<16xf32> to vector<16x1xf32>
    %75 = vector.broadcast %74 : vector<16x1xf32> to vector<16x16xf32>
    %76 = arith.subf %72, %75 : vector<16x16xf32>
    %77 = math.exp %76 : vector<16x16xf32>
    %cst_31 = arith.constant dense<0.000000e+00> : vector<16xf32>
    %78 = vector.multi_reduction <add>, %77, %cst_31 [1] : vector<16x16xf32> to vector<16xf32>
    %79 = vector.shape_cast %78 : vector<16xf32> to vector<16x1xf32>
    %80 = tpu.reciprocal %79 {approx = true} : vector<16x1xf32> -> vector<16x1xf32>
    %81 = vector.broadcast %80 : vector<16x1xf32> to vector<16x16xf32>
    %82 = arith.mulf %77, %81 : vector<16x16xf32>
    %83 = arith.truncf %82 : vector<16x16xf32> to vector<16x16xbf16>
    %84 = arith.truncf %66 : vector<16x8xf32> to vector<16x8xbf16>
    %cst_32 = arith.constant dense<0.000000e+00> : vector<16x8xf32>
    %85 = tpu.matmul %83, %84, %cst_32 {dimension_numbers = #tpu.dot_dimension_numbers<[1], [0], [0], [1], [0, 0, 1, 1], [], []>} : vector<16x16xbf16>, vector<16x8xbf16>, vector<16x8xf32> -> vector<16x8xf32>
    %86 = vector.extract_strided_slice %35 {offsets = [8, 0], sizes = [8, 32], strides = [1, 1]} : vector<32x32xf32> to vector<8x32xf32>
    %87 = arith.truncf %85 : vector<16x8xf32> to vector<16x8xbf16>
    %88 = arith.truncf %86 : vector<8x32xf32> to vector<8x32xbf16>
    %cst_33 = arith.constant dense<0.000000e+00> : vector<16x32xf32>
    %89 = tpu.matmul %87, %88, %cst_33 {dimension_numbers = #tpu.dot_dimension_numbers<[1], [0], [0], [1], [0, 0, 1, 1], [], []>} : vector<16x8xbf16>, vector<8x32xbf16>, vector<16x32xf32> -> vector<16x32xf32>
    %90 = arith.addf %63, %89 : vector<16x32xf32>
    %91 = vector.extract_strided_slice %33 {offsets = [0, 16], sizes = [16, 8], strides = [1, 1]} : vector<16x96xf32> to vector<16x8xf32>
    %92 = vector.extract_strided_slice %33 {offsets = [0, 48], sizes = [16, 8], strides = [1, 1]} : vector<16x96xf32> to vector<16x8xf32>
    %93 = vector.extract_strided_slice %33 {offsets = [0, 80], sizes = [16, 8], strides = [1, 1]} : vector<16x96xf32> to vector<16x8xf32>
    %94 = arith.truncf %91 : vector<16x8xf32> to vector<16x8xbf16>
    %95 = arith.truncf %92 : vector<16x8xf32> to vector<16x8xbf16>
    %cst_34 = arith.constant dense<0.000000e+00> : vector<16x16xf32>
    %96 = tpu.matmul %94, %95, %cst_34 {dimension_numbers = #tpu.dot_dimension_numbers<[1], [1], [0], [0], [0, 0, 1, 0], [], []>} : vector<16x8xbf16>, vector<16x8xbf16>, vector<16x16xf32> -> vector<16x16xf32>
    %cst_35 = arith.constant 0.353553385 : f32
    %97 = vector.broadcast %cst_35 : f32 to vector<16x16xf32>
    %98 = arith.mulf %96, %97 : vector<16x16xf32>
    %99 = arith.addf %98, %0 : vector<16x16xf32>
    %cst_36 = arith.constant dense<0xFF800000> : vector<16xf32>
    %100 = vector.multi_reduction <maximumf>, %99, %cst_36 [1] : vector<16x16xf32> to vector<16xf32>
    %101 = vector.shape_cast %100 : vector<16xf32> to vector<16x1xf32>
    %102 = vector.broadcast %101 : vector<16x1xf32> to vector<16x16xf32>
    %103 = arith.subf %99, %102 : vector<16x16xf32>
    %104 = math.exp %103 : vector<16x16xf32>
    %cst_37 = arith.constant dense<0.000000e+00> : vector<16xf32>
    %105 = vector.multi_reduction <add>, %104, %cst_37 [1] : vector<16x16xf32> to vector<16xf32>
    %106 = vector.shape_cast %105 : vector<16xf32> to vector<16x1xf32>
    %107 = tpu.reciprocal %106 {approx = true} : vector<16x1xf32> -> vector<16x1xf32>
    %108 = vector.broadcast %107 : vector<16x1xf32> to vector<16x16xf32>
    %109 = arith.mulf %104, %108 : vector<16x16xf32>
    %110 = arith.truncf %109 : vector<16x16xf32> to vector<16x16xbf16>
    %111 = arith.truncf %93 : vector<16x8xf32> to vector<16x8xbf16>
    %cst_38 = arith.constant dense<0.000000e+00> : vector<16x8xf32>
    %112 = tpu.matmul %110, %111, %cst_38 {dimension_numbers = #tpu.dot_dimension_numbers<[1], [0], [0], [1], [0, 0, 1, 1], [], []>} : vector<16x16xbf16>, vector<16x8xbf16>, vector<16x8xf32> -> vector<16x8xf32>
    %113 = vector.extract_strided_slice %35 {offsets = [16, 0], sizes = [8, 32], strides = [1, 1]} : vector<32x32xf32> to vector<8x32xf32>
    %114 = arith.truncf %112 : vector<16x8xf32> to vector<16x8xbf16>
    %115 = arith.truncf %113 : vector<8x32xf32> to vector<8x32xbf16>
    %cst_39 = arith.constant dense<0.000000e+00> : vector<16x32xf32>
    %116 = tpu.matmul %114, %115, %cst_39 {dimension_numbers = #tpu.dot_dimension_numbers<[1], [0], [0], [1], [0, 0, 1, 1], [], []>} : vector<16x8xbf16>, vector<8x32xbf16>, vector<16x32xf32> -> vector<16x32xf32>
    %117 = arith.addf %90, %116 : vector<16x32xf32>
    %118 = vector.extract_strided_slice %33 {offsets = [0, 24], sizes = [16, 8], strides = [1, 1]} : vector<16x96xf32> to vector<16x8xf32>
    %119 = vector.extract_strided_slice %33 {offsets = [0, 56], sizes = [16, 8], strides = [1, 1]} : vector<16x96xf32> to vector<16x8xf32>
    %120 = vector.extract_strided_slice %33 {offsets = [0, 88], sizes = [16, 8], strides = [1, 1]} : vector<16x96xf32> to vector<16x8xf32>
    %121 = arith.truncf %118 : vector<16x8xf32> to vector<16x8xbf16>
    %122 = arith.truncf %119 : vector<16x8xf32> to vector<16x8xbf16>
    %cst_40 = arith.constant dense<0.000000e+00> : vector<16x16xf32>
    %123 = tpu.matmul %121, %122, %cst_40 {dimension_numbers = #tpu.dot_dimension_numbers<[1], [1], [0], [0], [0, 0, 1, 0], [], []>} : vector<16x8xbf16>, vector<16x8xbf16>, vector<16x16xf32> -> vector<16x16xf32>
    %cst_41 = arith.constant 0.353553385 : f32
    %124 = vector.broadcast %cst_41 : f32 to vector<16x16xf32>
    %125 = arith.mulf %123, %124 : vector<16x16xf32>
    %126 = arith.addf %125, %0 : vector<16x16xf32>
    %cst_42 = arith.constant dense<0xFF800000> : vector<16xf32>
    %127 = vector.multi_reduction <maximumf>, %126, %cst_42 [1] : vector<16x16xf32> to vector<16xf32>
    %128 = vector.shape_cast %127 : vector<16xf32> to vector<16x1xf32>
    %129 = vector.broadcast %128 : vector<16x1xf32> to vector<16x16xf32>
    %130 = arith.subf %126, %129 : vector<16x16xf32>
    %131 = math.exp %130 : vector<16x16xf32>
    %cst_43 = arith.constant dense<0.000000e+00> : vector<16xf32>
    %132 = vector.multi_reduction <add>, %131, %cst_43 [1] : vector<16x16xf32> to vector<16xf32>
    %133 = vector.shape_cast %132 : vector<16xf32> to vector<16x1xf32>
    %134 = tpu.reciprocal %133 {approx = true} : vector<16x1xf32> -> vector<16x1xf32>
    %135 = vector.broadcast %134 : vector<16x1xf32> to vector<16x16xf32>
    %136 = arith.mulf %131, %135 : vector<16x16xf32>
    %137 = arith.truncf %136 : vector<16x16xf32> to vector<16x16xbf16>
    %138 = arith.truncf %120 : vector<16x8xf32> to vector<16x8xbf16>
    %cst_44 = arith.constant dense<0.000000e+00> : vector<16x8xf32>
    %139 = tpu.matmul %137, %138, %cst_44 {dimension_numbers = #tpu.dot_dimension_numbers<[1], [0], [0], [1], [0, 0, 1, 1], [], []>} : vector<16x16xbf16>, vector<16x8xbf16>, vector<16x8xf32> -> vector<16x8xf32>
    %140 = vector.extract_strided_slice %35 {offsets = [24, 0], sizes = [8, 32], strides = [1, 1]} : vector<32x32xf32> to vector<8x32xf32>
    %141 = arith.truncf %139 : vector<16x8xf32> to vector<16x8xbf16>
    %142 = arith.truncf %140 : vector<8x32xf32> to vector<8x32xbf16>
    %cst_45 = arith.constant dense<0.000000e+00> : vector<16x32xf32>
    %143 = tpu.matmul %141, %142, %cst_45 {dimension_numbers = #tpu.dot_dimension_numbers<[1], [0], [0], [1], [0, 0, 1, 1], [], []>} : vector<16x8xbf16>, vector<8x32xbf16>, vector<16x32xf32> -> vector<16x32xf32>
    %144 = arith.addf %117, %143 : vector<16x32xf32>
    %145 = arith.addf %25, %144 : vector<16x32xf32>
    %c0_46 = arith.constant 0 : index
    %c0_47 = arith.constant 0 : index
    %c0_48 = arith.constant 0 : index
    %146 = vector.load %arg8[%c0_46, %c0_47, %c0_48] : memref<2x1x32xf32, #tpu.memory_space<vmem>>, vector<1x1x32xf32>
    %147 = vector.shape_cast %146 : vector<1x1x32xf32> to vector<1x32xf32>
    %148 = vector.broadcast %147 : vector<1x32xf32> to vector<16x32xf32>
    %149 = arith.addf %145, %148 : vector<16x32xf32>
    %c0_49 = arith.constant 0 : index
    %c0_50 = arith.constant 0 : index
    %c0_51 = arith.constant 0 : index
    %150 = vector.load %arg9[%c0_49, %c0_50, %c0_51] : memref<2x1x32xf32, #tpu.memory_space<vmem>>, vector<1x1x32xf32>
    %151 = vector.shape_cast %150 : vector<1x1x32xf32> to vector<1x32xf32>
    %c0_52 = arith.constant 0 : index
    %c0_53 = arith.constant 0 : index
    %c0_54 = arith.constant 0 : index
    %152 = vector.load %arg10[%c0_52, %c0_53, %c0_54] : memref<2x1x32xf32, #tpu.memory_space<vmem>>, vector<1x1x32xf32>
    %153 = vector.shape_cast %152 : vector<1x1x32xf32> to vector<1x32xf32>
    %cst_55 = arith.constant dense<0.000000e+00> : vector<16xf32>
    %154 = vector.multi_reduction <add>, %149, %cst_55 [1] : vector<16x32xf32> to vector<16xf32>
    %155 = vector.shape_cast %154 : vector<16xf32> to vector<16x1xf32>
    %cst_56 = arith.constant 3.200000e+01 : f32
    %156 = vector.broadcast %cst_56 : f32 to vector<16x1xf32>
    %157 = arith.divf %155, %156 : vector<16x1xf32>
    %158 = vector.broadcast %157 : vector<16x1xf32> to vector<16x32xf32>
    %159 = arith.subf %149, %158 : vector<16x32xf32>
    %160 = arith.mulf %159, %159 : vector<16x32xf32>
    %cst_57 = arith.constant dense<0.000000e+00> : vector<16xf32>
    %161 = vector.multi_reduction <add>, %160, %cst_57 [1] : vector<16x32xf32> to vector<16xf32>
    %162 = vector.shape_cast %161 : vector<16xf32> to vector<16x1xf32>
    %cst_58 = arith.constant 3.200000e+01 : f32
    %163 = vector.broadcast %cst_58 : f32 to vector<16x1xf32>
    %164 = arith.divf %162, %163 : vector<16x1xf32>
    %165 = vector.broadcast %157 : vector<16x1xf32> to vector<16x32xf32>
    %166 = arith.subf %149, %165 : vector<16x32xf32>
    %cst_59 = arith.constant 9.99999996E-13 : f32
    %167 = vector.broadcast %cst_59 : f32 to vector<16x1xf32>
    %168 = arith.addf %164, %167 : vector<16x1xf32>
    %169 = math.rsqrt %168 : vector<16x1xf32>
    %170 = vector.broadcast %169 : vector<16x1xf32> to vector<16x32xf32>
    %171 = arith.mulf %166, %170 : vector<16x32xf32>
    %172 = vector.broadcast %151 : vector<1x32xf32> to vector<16x32xf32>
    %173 = arith.mulf %171, %172 : vector<16x32xf32>
    %174 = vector.broadcast %153 : vector<1x32xf32> to vector<16x32xf32>
    %175 = arith.addf %173, %174 : vector<16x32xf32>
    %c0_60 = arith.constant 0 : index
    %c0_61 = arith.constant 0 : index
    %c0_62 = arith.constant 0 : index
    %176 = vector.load %arg11[%c0_60, %c0_61, %c0_62] : memref<2x32x64xbf16, #tpu.memory_space<vmem>>, vector<1x32x64xbf16>
    %177 = vector.shape_cast %176 : vector<1x32x64xbf16> to vector<32x64xbf16>
    %178 = arith.truncf %175 : vector<16x32xf32> to vector<16x32xbf16>
    %cst_63 = arith.constant dense<0.000000e+00> : vector<16x64xf32>
    %179 = tpu.matmul %178, %177, %cst_63 {dimension_numbers = #tpu.dot_dimension_numbers<[1], [0], [0], [1], [0, 0, 1, 1], [], []>} : vector<16x32xbf16>, vector<32x64xbf16>, vector<16x64xf32> -> vector<16x64xf32>
    %c0_64 = arith.constant 0 : index
    %c0_65 = arith.constant 0 : index
    %c0_66 = arith.constant 0 : index
    %180 = vector.load %arg12[%c0_64, %c0_65, %c0_66] : memref<2x1x64xf32, #tpu.memory_space<vmem>>, vector<1x1x64xf32>
    %181 = vector.shape_cast %180 : vector<1x1x64xf32> to vector<1x64xf32>
    %182 = vector.broadcast %181 : vector<1x64xf32> to vector<16x64xf32>
    %183 = arith.addf %179, %182 : vector<16x64xf32>
    %cst_67 = arith.constant 5.000000e-01 : f32
    %184 = vector.broadcast %cst_67 : f32 to vector<16x64xf32>
    %185 = arith.mulf %184, %183 : vector<16x64xf32>
    %cst_68 = arith.constant 0.707106769 : f32
    %186 = vector.broadcast %cst_68 : f32 to vector<16x64xf32>
    %187 = arith.mulf %183, %186 : vector<16x64xf32>
    %188 = math.erf %187 : vector<16x64xf32>
    %cst_69 = arith.constant 1.000000e+00 : f32
    %189 = vector.broadcast %cst_69 : f32 to vector<16x64xf32>
    %190 = arith.addf %189, %188 : vector<16x64xf32>
    %191 = arith.mulf %185, %190 : vector<16x64xf32>
    %c0_70 = arith.constant 0 : index
    %c0_71 = arith.constant 0 : index
    %c0_72 = arith.constant 0 : index
    %192 = vector.load %arg13[%c0_70, %c0_71, %c0_72] : memref<2x64x32xbf16, #tpu.memory_space<vmem>>, vector<1x64x32xbf16>
    %193 = vector.shape_cast %192 : vector<1x64x32xbf16> to vector<64x32xbf16>
    %194 = arith.truncf %191 : vector<16x64xf32> to vector<16x64xbf16>
    %cst_73 = arith.constant dense<0.000000e+00> : vector<16x32xf32>
    %195 = tpu.matmul %194, %193, %cst_73 {dimension_numbers = #tpu.dot_dimension_numbers<[1], [0], [0], [1], [0, 0, 1, 1], [], []>} : vector<16x64xbf16>, vector<64x32xbf16>, vector<16x32xf32> -> vector<16x32xf32>
    %c0_74 = arith.constant 0 : index
    %c0_75 = arith.constant 0 : index
    %c0_76 = arith.constant 0 : index
    %196 = vector.load %arg14[%c0_74, %c0_75, %c0_76] : memref<2x1x32xf32, #tpu.memory_space<vmem>>, vector<1x1x32xf32>
    %197 = vector.shape_cast %196 : vector<1x1x32xf32> to vector<1x32xf32>
    %198 = vector.broadcast %197 : vector<1x32xf32> to vector<16x32xf32>
    %199 = arith.addf %195, %198 : vector<16x32xf32>
    %200 = arith.addf %175, %199 : vector<16x32xf32>
    %c0_77 = arith.constant 0 : index
    %c0_78 = arith.constant 0 : index
    %c0_79 = arith.constant 0 : index
    %201 = vector.load %arg15[%c0_77, %c0_78, %c0_79] : memref<2x1x32xf32, #tpu.memory_space<vmem>>, vector<1x1x32xf32>
    %202 = vector.shape_cast %201 : vector<1x1x32xf32> to vector<1x32xf32>
    %c0_80 = arith.constant 0 : index
    %c0_81 = arith.constant 0 : index
    %c0_82 = arith.constant 0 : index
    %203 = vector.load %arg16[%c0_80, %c0_81, %c0_82] : memref<2x1x32xf32, #tpu.memory_space<vmem>>, vector<1x1x32xf32>
    %204 = vector.shape_cast %203 : vector<1x1x32xf32> to vector<1x32xf32>
    %cst_83 = arith.constant dense<0.000000e+00> : vector<16xf32>
    %205 = vector.multi_reduction <add>, %200, %cst_83 [1] : vector<16x32xf32> to vector<16xf32>
    %206 = vector.shape_cast %205 : vector<16xf32> to vector<16x1xf32>
    %cst_84 = arith.constant 3.200000e+01 : f32
    %207 = vector.broadcast %cst_84 : f32 to vector<16x1xf32>
    %208 = arith.divf %206, %207 : vector<16x1xf32>
    %209 = vector.broadcast %208 : vector<16x1xf32> to vector<16x32xf32>
    %210 = arith.subf %200, %209 : vector<16x32xf32>
    %211 = arith.mulf %210, %210 : vector<16x32xf32>
    %cst_85 = arith.constant dense<0.000000e+00> : vector<16xf32>
    %212 = vector.multi_reduction <add>, %211, %cst_85 [1] : vector<16x32xf32> to vector<16xf32>
    %213 = vector.shape_cast %212 : vector<16xf32> to vector<16x1xf32>
    %cst_86 = arith.constant 3.200000e+01 : f32
    %214 = vector.broadcast %cst_86 : f32 to vector<16x1xf32>
    %215 = arith.divf %213, %214 : vector<16x1xf32>
    %216 = vector.broadcast %208 : vector<16x1xf32> to vector<16x32xf32>
    %217 = arith.subf %200, %216 : vector<16x32xf32>
    %cst_87 = arith.constant 9.99999996E-13 : f32
    %218 = vector.broadcast %cst_87 : f32 to vector<16x1xf32>
    %219 = arith.addf %215, %218 : vector<16x1xf32>
    %220 = math.rsqrt %219 : vector<16x1xf32>
    %221 = vector.broadcast %220 : vector<16x1xf32> to vector<16x32xf32>
    %222 = arith.mulf %217, %221 : vector<16x32xf32>
    %223 = vector.broadcast %202 : vector<1x32xf32> to vector<16x32xf32>
    %224 = arith.mulf %222, %223 : vector<16x32xf32>
    %225 = vector.broadcast %204 : vector<1x32xf32> to vector<16x32xf32>
    %226 = arith.addf %224, %225 : vector<16x32xf32>
    %c1 = arith.constant 1 : index
    %c0_88 = arith.constant 0 : index
    %c0_89 = arith.constant 0 : index
    %227 = vector.load %arg5[%c1, %c0_88, %c0_89] : memref<2x32x96xbf16, #tpu.memory_space<vmem>>, vector<1x32x96xbf16>
    %228 = vector.shape_cast %227 : vector<1x32x96xbf16> to vector<32x96xbf16>
    %229 = arith.truncf %226 : vector<16x32xf32> to vector<16x32xbf16>
    %cst_90 = arith.constant dense<0.000000e+00> : vector<16x96xf32>
    %230 = tpu.matmul %229, %228, %cst_90 {dimension_numbers = #tpu.dot_dimension_numbers<[1], [0], [0], [1], [0, 0, 1, 1], [], []>} : vector<16x32xbf16>, vector<32x96xbf16>, vector<16x96xf32> -> vector<16x96xf32>
    %c1_91 = arith.constant 1 : index
    %c0_92 = arith.constant 0 : index
    %c0_93 = arith.constant 0 : index
    %231 = vector.load %arg6[%c1_91, %c0_92, %c0_93] : memref<2x1x96xf32, #tpu.memory_space<vmem>>, vector<1x1x96xf32>
    %232 = vector.shape_cast %231 : vector<1x1x96xf32> to vector<1x96xf32>
    %233 = vector.broadcast %232 : vector<1x96xf32> to vector<16x96xf32>
    %234 = arith.addf %230, %233 : vector<16x96xf32>
    %c1_94 = arith.constant 1 : index
    %c0_95 = arith.constant 0 : index
    %c0_96 = arith.constant 0 : index
    %235 = vector.load %arg7[%c1_94, %c0_95, %c0_96] : memref<2x32x32xf32, #tpu.memory_space<vmem>>, vector<1x32x32xf32>
    %236 = vector.shape_cast %235 : vector<1x32x32xf32> to vector<32x32xf32>
    %cst_97 = arith.constant 0.000000e+00 : f32
    %237 = vector.broadcast %cst_97 : f32 to vector<16x32xf32>
    %238 = vector.extract_strided_slice %234 {offsets = [0, 0], sizes = [16, 8], strides = [1, 1]} : vector<16x96xf32> to vector<16x8xf32>
    %239 = vector.extract_strided_slice %234 {offsets = [0, 32], sizes = [16, 8], strides = [1, 1]} : vector<16x96xf32> to vector<16x8xf32>
    %240 = vector.extract_strided_slice %234 {offsets = [0, 64], sizes = [16, 8], strides = [1, 1]} : vector<16x96xf32> to vector<16x8xf32>
    %241 = arith.truncf %238 : vector<16x8xf32> to vector<16x8xbf16>
    %242 = arith.truncf %239 : vector<16x8xf32> to vector<16x8xbf16>
    %cst_98 = arith.constant dense<0.000000e+00> : vector<16x16xf32>
    %243 = tpu.matmul %241, %242, %cst_98 {dimension_numbers = #tpu.dot_dimension_numbers<[1], [1], [0], [0], [0, 0, 1, 0], [], []>} : vector<16x8xbf16>, vector<16x8xbf16>, vector<16x16xf32> -> vector<16x16xf32>
    %cst_99 = arith.constant 0.353553385 : f32
    %244 = vector.broadcast %cst_99 : f32 to vector<16x16xf32>
    %245 = arith.mulf %243, %244 : vector<16x16xf32>
    %246 = arith.addf %245, %0 : vector<16x16xf32>
    %cst_100 = arith.constant dense<0xFF800000> : vector<16xf32>
    %247 = vector.multi_reduction <maximumf>, %246, %cst_100 [1] : vector<16x16xf32> to vector<16xf32>
    %248 = vector.shape_cast %247 : vector<16xf32> to vector<16x1xf32>
    %249 = vector.broadcast %248 : vector<16x1xf32> to vector<16x16xf32>
    %250 = arith.subf %246, %249 : vector<16x16xf32>
    %251 = math.exp %250 : vector<16x16xf32>
    %cst_101 = arith.constant dense<0.000000e+00> : vector<16xf32>
    %252 = vector.multi_reduction <add>, %251, %cst_101 [1] : vector<16x16xf32> to vector<16xf32>
    %253 = vector.shape_cast %252 : vector<16xf32> to vector<16x1xf32>
    %254 = tpu.reciprocal %253 {approx = true} : vector<16x1xf32> -> vector<16x1xf32>
    %255 = vector.broadcast %254 : vector<16x1xf32> to vector<16x16xf32>
    %256 = arith.mulf %251, %255 : vector<16x16xf32>
    %257 = arith.truncf %256 : vector<16x16xf32> to vector<16x16xbf16>
    %258 = arith.truncf %240 : vector<16x8xf32> to vector<16x8xbf16>
    %cst_102 = arith.constant dense<0.000000e+00> : vector<16x8xf32>
    %259 = tpu.matmul %257, %258, %cst_102 {dimension_numbers = #tpu.dot_dimension_numbers<[1], [0], [0], [1], [0, 0, 1, 1], [], []>} : vector<16x16xbf16>, vector<16x8xbf16>, vector<16x8xf32> -> vector<16x8xf32>
    %260 = vector.extract_strided_slice %236 {offsets = [0, 0], sizes = [8, 32], strides = [1, 1]} : vector<32x32xf32> to vector<8x32xf32>
    %261 = arith.truncf %259 : vector<16x8xf32> to vector<16x8xbf16>
    %262 = arith.truncf %260 : vector<8x32xf32> to vector<8x32xbf16>
    %cst_103 = arith.constant dense<0.000000e+00> : vector<16x32xf32>
    %263 = tpu.matmul %261, %262, %cst_103 {dimension_numbers = #tpu.dot_dimension_numbers<[1], [0], [0], [1], [0, 0, 1, 1], [], []>} : vector<16x8xbf16>, vector<8x32xbf16>, vector<16x32xf32> -> vector<16x32xf32>
    %264 = arith.addf %237, %263 : vector<16x32xf32>
    %265 = vector.extract_strided_slice %234 {offsets = [0, 8], sizes = [16, 8], strides = [1, 1]} : vector<16x96xf32> to vector<16x8xf32>
    %266 = vector.extract_strided_slice %234 {offsets = [0, 40], sizes = [16, 8], strides = [1, 1]} : vector<16x96xf32> to vector<16x8xf32>
    %267 = vector.extract_strided_slice %234 {offsets = [0, 72], sizes = [16, 8], strides = [1, 1]} : vector<16x96xf32> to vector<16x8xf32>
    %268 = arith.truncf %265 : vector<16x8xf32> to vector<16x8xbf16>
    %269 = arith.truncf %266 : vector<16x8xf32> to vector<16x8xbf16>
    %cst_104 = arith.constant dense<0.000000e+00> : vector<16x16xf32>
    %270 = tpu.matmul %268, %269, %cst_104 {dimension_numbers = #tpu.dot_dimension_numbers<[1], [1], [0], [0], [0, 0, 1, 0], [], []>} : vector<16x8xbf16>, vector<16x8xbf16>, vector<16x16xf32> -> vector<16x16xf32>
    %cst_105 = arith.constant 0.353553385 : f32
    %271 = vector.broadcast %cst_105 : f32 to vector<16x16xf32>
    %272 = arith.mulf %270, %271 : vector<16x16xf32>
    %273 = arith.addf %272, %0 : vector<16x16xf32>
    %cst_106 = arith.constant dense<0xFF800000> : vector<16xf32>
    %274 = vector.multi_reduction <maximumf>, %273, %cst_106 [1] : vector<16x16xf32> to vector<16xf32>
    %275 = vector.shape_cast %274 : vector<16xf32> to vector<16x1xf32>
    %276 = vector.broadcast %275 : vector<16x1xf32> to vector<16x16xf32>
    %277 = arith.subf %273, %276 : vector<16x16xf32>
    %278 = math.exp %277 : vector<16x16xf32>
    %cst_107 = arith.constant dense<0.000000e+00> : vector<16xf32>
    %279 = vector.multi_reduction <add>, %278, %cst_107 [1] : vector<16x16xf32> to vector<16xf32>
    %280 = vector.shape_cast %279 : vector<16xf32> to vector<16x1xf32>
    %281 = tpu.reciprocal %280 {approx = true} : vector<16x1xf32> -> vector<16x1xf32>
    %282 = vector.broadcast %281 : vector<16x1xf32> to vector<16x16xf32>
    %283 = arith.mulf %278, %282 : vector<16x16xf32>
    %284 = arith.truncf %283 : vector<16x16xf32> to vector<16x16xbf16>
    %285 = arith.truncf %267 : vector<16x8xf32> to vector<16x8xbf16>
    %cst_108 = arith.constant dense<0.000000e+00> : vector<16x8xf32>
    %286 = tpu.matmul %284, %285, %cst_108 {dimension_numbers = #tpu.dot_dimension_numbers<[1], [0], [0], [1], [0, 0, 1, 1], [], []>} : vector<16x16xbf16>, vector<16x8xbf16>, vector<16x8xf32> -> vector<16x8xf32>
    %287 = vector.extract_strided_slice %236 {offsets = [8, 0], sizes = [8, 32], strides = [1, 1]} : vector<32x32xf32> to vector<8x32xf32>
    %288 = arith.truncf %286 : vector<16x8xf32> to vector<16x8xbf16>
    %289 = arith.truncf %287 : vector<8x32xf32> to vector<8x32xbf16>
    %cst_109 = arith.constant dense<0.000000e+00> : vector<16x32xf32>
    %290 = tpu.matmul %288, %289, %cst_109 {dimension_numbers = #tpu.dot_dimension_numbers<[1], [0], [0], [1], [0, 0, 1, 1], [], []>} : vector<16x8xbf16>, vector<8x32xbf16>, vector<16x32xf32> -> vector<16x32xf32>
    %291 = arith.addf %264, %290 : vector<16x32xf32>
    %292 = vector.extract_strided_slice %234 {offsets = [0, 16], sizes = [16, 8], strides = [1, 1]} : vector<16x96xf32> to vector<16x8xf32>
    %293 = vector.extract_strided_slice %234 {offsets = [0, 48], sizes = [16, 8], strides = [1, 1]} : vector<16x96xf32> to vector<16x8xf32>
    %294 = vector.extract_strided_slice %234 {offsets = [0, 80], sizes = [16, 8], strides = [1, 1]} : vector<16x96xf32> to vector<16x8xf32>
    %295 = arith.truncf %292 : vector<16x8xf32> to vector<16x8xbf16>
    %296 = arith.truncf %293 : vector<16x8xf32> to vector<16x8xbf16>
    %cst_110 = arith.constant dense<0.000000e+00> : vector<16x16xf32>
    %297 = tpu.matmul %295, %296, %cst_110 {dimension_numbers = #tpu.dot_dimension_numbers<[1], [1], [0], [0], [0, 0, 1, 0], [], []>} : vector<16x8xbf16>, vector<16x8xbf16>, vector<16x16xf32> -> vector<16x16xf32>
    %cst_111 = arith.constant 0.353553385 : f32
    %298 = vector.broadcast %cst_111 : f32 to vector<16x16xf32>
    %299 = arith.mulf %297, %298 : vector<16x16xf32>
    %300 = arith.addf %299, %0 : vector<16x16xf32>
    %cst_112 = arith.constant dense<0xFF800000> : vector<16xf32>
    %301 = vector.multi_reduction <maximumf>, %300, %cst_112 [1] : vector<16x16xf32> to vector<16xf32>
    %302 = vector.shape_cast %301 : vector<16xf32> to vector<16x1xf32>
    %303 = vector.broadcast %302 : vector<16x1xf32> to vector<16x16xf32>
    %304 = arith.subf %300, %303 : vector<16x16xf32>
    %305 = math.exp %304 : vector<16x16xf32>
    %cst_113 = arith.constant dense<0.000000e+00> : vector<16xf32>
    %306 = vector.multi_reduction <add>, %305, %cst_113 [1] : vector<16x16xf32> to vector<16xf32>
    %307 = vector.shape_cast %306 : vector<16xf32> to vector<16x1xf32>
    %308 = tpu.reciprocal %307 {approx = true} : vector<16x1xf32> -> vector<16x1xf32>
    %309 = vector.broadcast %308 : vector<16x1xf32> to vector<16x16xf32>
    %310 = arith.mulf %305, %309 : vector<16x16xf32>
    %311 = arith.truncf %310 : vector<16x16xf32> to vector<16x16xbf16>
    %312 = arith.truncf %294 : vector<16x8xf32> to vector<16x8xbf16>
    %cst_114 = arith.constant dense<0.000000e+00> : vector<16x8xf32>
    %313 = tpu.matmul %311, %312, %cst_114 {dimension_numbers = #tpu.dot_dimension_numbers<[1], [0], [0], [1], [0, 0, 1, 1], [], []>} : vector<16x16xbf16>, vector<16x8xbf16>, vector<16x8xf32> -> vector<16x8xf32>
    %314 = vector.extract_strided_slice %236 {offsets = [16, 0], sizes = [8, 32], strides = [1, 1]} : vector<32x32xf32> to vector<8x32xf32>
    %315 = arith.truncf %313 : vector<16x8xf32> to vector<16x8xbf16>
    %316 = arith.truncf %314 : vector<8x32xf32> to vector<8x32xbf16>
    %cst_115 = arith.constant dense<0.000000e+00> : vector<16x32xf32>
    %317 = tpu.matmul %315, %316, %cst_115 {dimension_numbers = #tpu.dot_dimension_numbers<[1], [0], [0], [1], [0, 0, 1, 1], [], []>} : vector<16x8xbf16>, vector<8x32xbf16>, vector<16x32xf32> -> vector<16x32xf32>
    %318 = arith.addf %291, %317 : vector<16x32xf32>
    %319 = vector.extract_strided_slice %234 {offsets = [0, 24], sizes = [16, 8], strides = [1, 1]} : vector<16x96xf32> to vector<16x8xf32>
    %320 = vector.extract_strided_slice %234 {offsets = [0, 56], sizes = [16, 8], strides = [1, 1]} : vector<16x96xf32> to vector<16x8xf32>
    %321 = vector.extract_strided_slice %234 {offsets = [0, 88], sizes = [16, 8], strides = [1, 1]} : vector<16x96xf32> to vector<16x8xf32>
    %322 = arith.truncf %319 : vector<16x8xf32> to vector<16x8xbf16>
    %323 = arith.truncf %320 : vector<16x8xf32> to vector<16x8xbf16>
    %cst_116 = arith.constant dense<0.000000e+00> : vector<16x16xf32>
    %324 = tpu.matmul %322, %323, %cst_116 {dimension_numbers = #tpu.dot_dimension_numbers<[1], [1], [0], [0], [0, 0, 1, 0], [], []>} : vector<16x8xbf16>, vector<16x8xbf16>, vector<16x16xf32> -> vector<16x16xf32>
    %cst_117 = arith.constant 0.353553385 : f32
    %325 = vector.broadcast %cst_117 : f32 to vector<16x16xf32>
    %326 = arith.mulf %324, %325 : vector<16x16xf32>
    %327 = arith.addf %326, %0 : vector<16x16xf32>
    %cst_118 = arith.constant dense<0xFF800000> : vector<16xf32>
    %328 = vector.multi_reduction <maximumf>, %327, %cst_118 [1] : vector<16x16xf32> to vector<16xf32>
    %329 = vector.shape_cast %328 : vector<16xf32> to vector<16x1xf32>
    %330 = vector.broadcast %329 : vector<16x1xf32> to vector<16x16xf32>
    %331 = arith.subf %327, %330 : vector<16x16xf32>
    %332 = math.exp %331 : vector<16x16xf32>
    %cst_119 = arith.constant dense<0.000000e+00> : vector<16xf32>
    %333 = vector.multi_reduction <add>, %332, %cst_119 [1] : vector<16x16xf32> to vector<16xf32>
    %334 = vector.shape_cast %333 : vector<16xf32> to vector<16x1xf32>
    %335 = tpu.reciprocal %334 {approx = true} : vector<16x1xf32> -> vector<16x1xf32>
    %336 = vector.broadcast %335 : vector<16x1xf32> to vector<16x16xf32>
    %337 = arith.mulf %332, %336 : vector<16x16xf32>
    %338 = arith.truncf %337 : vector<16x16xf32> to vector<16x16xbf16>
    %339 = arith.truncf %321 : vector<16x8xf32> to vector<16x8xbf16>
    %cst_120 = arith.constant dense<0.000000e+00> : vector<16x8xf32>
    %340 = tpu.matmul %338, %339, %cst_120 {dimension_numbers = #tpu.dot_dimension_numbers<[1], [0], [0], [1], [0, 0, 1, 1], [], []>} : vector<16x16xbf16>, vector<16x8xbf16>, vector<16x8xf32> -> vector<16x8xf32>
    %341 = vector.extract_strided_slice %236 {offsets = [24, 0], sizes = [8, 32], strides = [1, 1]} : vector<32x32xf32> to vector<8x32xf32>
    %342 = arith.truncf %340 : vector<16x8xf32> to vector<16x8xbf16>
    %343 = arith.truncf %341 : vector<8x32xf32> to vector<8x32xbf16>
    %cst_121 = arith.constant dense<0.000000e+00> : vector<16x32xf32>
    %344 = tpu.matmul %342, %343, %cst_121 {dimension_numbers = #tpu.dot_dimension_numbers<[1], [0], [0], [1], [0, 0, 1, 1], [], []>} : vector<16x8xbf16>, vector<8x32xbf16>, vector<16x32xf32> -> vector<16x32xf32>
    %345 = arith.addf %318, %344 : vector<16x32xf32>
    %346 = arith.addf %226, %345 : vector<16x32xf32>
    %c1_122 = arith.constant 1 : index
    %c0_123 = arith.constant 0 : index
    %c0_124 = arith.constant 0 : index
    %347 = vector.load %arg8[%c1_122, %c0_123, %c0_124] : memref<2x1x32xf32, #tpu.memory_space<vmem>>, vector<1x1x32xf32>
    %348 = vector.shape_cast %347 : vector<1x1x32xf32> to vector<1x32xf32>
    %349 = vector.broadcast %348 : vector<1x32xf32> to vector<16x32xf32>
    %350 = arith.addf %346, %349 : vector<16x32xf32>
    %c1_125 = arith.constant 1 : index
    %c0_126 = arith.constant 0 : index
    %c0_127 = arith.constant 0 : index
    %351 = vector.load %arg9[%c1_125, %c0_126, %c0_127] : memref<2x1x32xf32, #tpu.memory_space<vmem>>, vector<1x1x32xf32>
    %352 = vector.shape_cast %351 : vector<1x1x32xf32> to vector<1x32xf32>
    %c1_128 = arith.constant 1 : index
    %c0_129 = arith.constant 0 : index
    %c0_130 = arith.constant 0 : index
    %353 = vector.load %arg10[%c1_128, %c0_129, %c0_130] : memref<2x1x32xf32, #tpu.memory_space<vmem>>, vector<1x1x32xf32>
    %354 = vector.shape_cast %353 : vector<1x1x32xf32> to vector<1x32xf32>
    %cst_131 = arith.constant dense<0.000000e+00> : vector<16xf32>
    %355 = vector.multi_reduction <add>, %350, %cst_131 [1] : vector<16x32xf32> to vector<16xf32>
    %356 = vector.shape_cast %355 : vector<16xf32> to vector<16x1xf32>
    %cst_132 = arith.constant 3.200000e+01 : f32
    %357 = vector.broadcast %cst_132 : f32 to vector<16x1xf32>
    %358 = arith.divf %356, %357 : vector<16x1xf32>
    %359 = vector.broadcast %358 : vector<16x1xf32> to vector<16x32xf32>
    %360 = arith.subf %350, %359 : vector<16x32xf32>
    %361 = arith.mulf %360, %360 : vector<16x32xf32>
    %cst_133 = arith.constant dense<0.000000e+00> : vector<16xf32>
    %362 = vector.multi_reduction <add>, %361, %cst_133 [1] : vector<16x32xf32> to vector<16xf32>
    %363 = vector.shape_cast %362 : vector<16xf32> to vector<16x1xf32>
    %cst_134 = arith.constant 3.200000e+01 : f32
    %364 = vector.broadcast %cst_134 : f32 to vector<16x1xf32>
    %365 = arith.divf %363, %364 : vector<16x1xf32>
    %366 = vector.broadcast %358 : vector<16x1xf32> to vector<16x32xf32>
    %367 = arith.subf %350, %366 : vector<16x32xf32>
    %cst_135 = arith.constant 9.99999996E-13 : f32
    %368 = vector.broadcast %cst_135 : f32 to vector<16x1xf32>
    %369 = arith.addf %365, %368 : vector<16x1xf32>
    %370 = math.rsqrt %369 : vector<16x1xf32>
    %371 = vector.broadcast %370 : vector<16x1xf32> to vector<16x32xf32>
    %372 = arith.mulf %367, %371 : vector<16x32xf32>
    %373 = vector.broadcast %352 : vector<1x32xf32> to vector<16x32xf32>
    %374 = arith.mulf %372, %373 : vector<16x32xf32>
    %375 = vector.broadcast %354 : vector<1x32xf32> to vector<16x32xf32>
    %376 = arith.addf %374, %375 : vector<16x32xf32>
    %c1_136 = arith.constant 1 : index
    %c0_137 = arith.constant 0 : index
    %c0_138 = arith.constant 0 : index
    %377 = vector.load %arg11[%c1_136, %c0_137, %c0_138] : memref<2x32x64xbf16, #tpu.memory_space<vmem>>, vector<1x32x64xbf16>
    %378 = vector.shape_cast %377 : vector<1x32x64xbf16> to vector<32x64xbf16>
    %379 = arith.truncf %376 : vector<16x32xf32> to vector<16x32xbf16>
    %cst_139 = arith.constant dense<0.000000e+00> : vector<16x64xf32>
    %380 = tpu.matmul %379, %378, %cst_139 {dimension_numbers = #tpu.dot_dimension_numbers<[1], [0], [0], [1], [0, 0, 1, 1], [], []>} : vector<16x32xbf16>, vector<32x64xbf16>, vector<16x64xf32> -> vector<16x64xf32>
    %c1_140 = arith.constant 1 : index
    %c0_141 = arith.constant 0 : index
    %c0_142 = arith.constant 0 : index
    %381 = vector.load %arg12[%c1_140, %c0_141, %c0_142] : memref<2x1x64xf32, #tpu.memory_space<vmem>>, vector<1x1x64xf32>
    %382 = vector.shape_cast %381 : vector<1x1x64xf32> to vector<1x64xf32>
    %383 = vector.broadcast %382 : vector<1x64xf32> to vector<16x64xf32>
    %384 = arith.addf %380, %383 : vector<16x64xf32>
    %cst_143 = arith.constant 5.000000e-01 : f32
    %385 = vector.broadcast %cst_143 : f32 to vector<16x64xf32>
    %386 = arith.mulf %385, %384 : vector<16x64xf32>
    %cst_144 = arith.constant 0.707106769 : f32
    %387 = vector.broadcast %cst_144 : f32 to vector<16x64xf32>
    %388 = arith.mulf %384, %387 : vector<16x64xf32>
    %389 = math.erf %388 : vector<16x64xf32>
    %cst_145 = arith.constant 1.000000e+00 : f32
    %390 = vector.broadcast %cst_145 : f32 to vector<16x64xf32>
    %391 = arith.addf %390, %389 : vector<16x64xf32>
    %392 = arith.mulf %386, %391 : vector<16x64xf32>
    %c1_146 = arith.constant 1 : index
    %c0_147 = arith.constant 0 : index
    %c0_148 = arith.constant 0 : index
    %393 = vector.load %arg13[%c1_146, %c0_147, %c0_148] : memref<2x64x32xbf16, #tpu.memory_space<vmem>>, vector<1x64x32xbf16>
    %394 = vector.shape_cast %393 : vector<1x64x32xbf16> to vector<64x32xbf16>
    %395 = arith.truncf %392 : vector<16x64xf32> to vector<16x64xbf16>
    %cst_149 = arith.constant dense<0.000000e+00> : vector<16x32xf32>
    %396 = tpu.matmul %395, %394, %cst_149 {dimension_numbers = #tpu.dot_dimension_numbers<[1], [0], [0], [1], [0, 0, 1, 1], [], []>} : vector<16x64xbf16>, vector<64x32xbf16>, vector<16x32xf32> -> vector<16x32xf32>
    %c1_150 = arith.constant 1 : index
    %c0_151 = arith.constant 0 : index
    %c0_152 = arith.constant 0 : index
    %397 = vector.load %arg14[%c1_150, %c0_151, %c0_152] : memref<2x1x32xf32, #tpu.memory_space<vmem>>, vector<1x1x32xf32>
    %398 = vector.shape_cast %397 : vector<1x1x32xf32> to vector<1x32xf32>
    %399 = vector.broadcast %398 : vector<1x32xf32> to vector<16x32xf32>
    %400 = arith.addf %396, %399 : vector<16x32xf32>
    %401 = arith.addf %376, %400 : vector<16x32xf32>
    %c1_153 = arith.constant 1 : index
    %c0_154 = arith.constant 0 : index
    %c0_155 = arith.constant 0 : index
    %402 = vector.load %arg15[%c1_153, %c0_154, %c0_155] : memref<2x1x32xf32, #tpu.memory_space<vmem>>, vector<1x1x32xf32>
    %403 = vector.shape_cast %402 : vector<1x1x32xf32> to vector<1x32xf32>
    %c1_156 = arith.constant 1 : index
    %c0_157 = arith.constant 0 : index
    %c0_158 = arith.constant 0 : index
    %404 = vector.load %arg16[%c1_156, %c0_157, %c0_158] : memref<2x1x32xf32, #tpu.memory_space<vmem>>, vector<1x1x32xf32>
    %405 = vector.shape_cast %404 : vector<1x1x32xf32> to vector<1x32xf32>
    %cst_159 = arith.constant dense<0.000000e+00> : vector<16xf32>
    %406 = vector.multi_reduction <add>, %401, %cst_159 [1] : vector<16x32xf32> to vector<16xf32>
    %407 = vector.shape_cast %406 : vector<16xf32> to vector<16x1xf32>
    %cst_160 = arith.constant 3.200000e+01 : f32
    %408 = vector.broadcast %cst_160 : f32 to vector<16x1xf32>
    %409 = arith.divf %407, %408 : vector<16x1xf32>
    %410 = vector.broadcast %409 : vector<16x1xf32> to vector<16x32xf32>
    %411 = arith.subf %401, %410 : vector<16x32xf32>
    %412 = arith.mulf %411, %411 : vector<16x32xf32>
    %cst_161 = arith.constant dense<0.000000e+00> : vector<16xf32>
    %413 = vector.multi_reduction <add>, %412, %cst_161 [1] : vector<16x32xf32> to vector<16xf32>
    %414 = vector.shape_cast %413 : vector<16xf32> to vector<16x1xf32>
    %cst_162 = arith.constant 3.200000e+01 : f32
    %415 = vector.broadcast %cst_162 : f32 to vector<16x1xf32>
    %416 = arith.divf %414, %415 : vector<16x1xf32>
    %417 = vector.broadcast %409 : vector<16x1xf32> to vector<16x32xf32>
    %418 = arith.subf %401, %417 : vector<16x32xf32>
    %cst_163 = arith.constant 9.99999996E-13 : f32
    %419 = vector.broadcast %cst_163 : f32 to vector<16x1xf32>
    %420 = arith.addf %416, %419 : vector<16x1xf32>
    %421 = math.rsqrt %420 : vector<16x1xf32>
    %422 = vector.broadcast %421 : vector<16x1xf32> to vector<16x32xf32>
    %423 = arith.mulf %418, %422 : vector<16x32xf32>
    %424 = vector.broadcast %403 : vector<1x32xf32> to vector<16x32xf32>
    %425 = arith.mulf %423, %424 : vector<16x32xf32>
    %426 = vector.broadcast %405 : vector<1x32xf32> to vector<16x32xf32>
    %427 = arith.addf %425, %426 : vector<16x32xf32>
    %c0_164 = arith.constant 0 : index
    %c0_165 = arith.constant 0 : index
    %428 = vector.load %arg17[%c0_164, %c0_165] : memref<32x128xbf16, #tpu.memory_space<vmem>>, vector<32x128xbf16>
    %429 = arith.truncf %427 : vector<16x32xf32> to vector<16x32xbf16>
    %cst_166 = arith.constant dense<0.000000e+00> : vector<16x128xf32>
    %430 = tpu.matmul %429, %428, %cst_166 {dimension_numbers = #tpu.dot_dimension_numbers<[1], [0], [0], [1], [0, 0, 1, 1], [], []>} : vector<16x32xbf16>, vector<32x128xbf16>, vector<16x128xf32> -> vector<16x128xf32>
    %c0_167 = arith.constant 0 : index
    %c0_168 = arith.constant 0 : index
    %431 = vector.load %arg18[%c0_167, %c0_168] : memref<1x128xf32, #tpu.memory_space<vmem>>, vector<1x128xf32>
    %432 = vector.broadcast %431 : vector<1x128xf32> to vector<16x128xf32>
    %433 = arith.addf %430, %432 : vector<16x128xf32>
    %434 = math.tanh %433 : vector<16x128xf32>
    %c0_169 = arith.constant 0 : index
    %c0_170 = arith.constant 0 : index
    %435 = vector.load %arg19[%c0_169, %c0_170] : memref<1x128xf32, #tpu.memory_space<vmem>>, vector<1x128xf32>
    %436 = vector.broadcast %435 : vector<1x128xf32> to vector<16x128xf32>
    %437 = arith.mulf %434, %436 : vector<16x128xf32>
    %cst_171 = arith.constant dense<0.000000e+00> : vector<16xf32>
    %438 = vector.multi_reduction <add>, %437, %cst_171 [1] : vector<16x128xf32> to vector<16xf32>
    %439 = vector.shape_cast %438 : vector<16xf32> to vector<16x1xf32>
    %c0_172 = arith.constant 0 : index
    %c0_173 = arith.constant 0 : index
    %440 = vector.load %arg20[%c0_172, %c0_173] : memref<1x1xf32, #tpu.memory_space<vmem>>, vector<1x1xf32>
    %441 = vector.broadcast %440 : vector<1x1xf32> to vector<16x1xf32>
    %442 = arith.addf %439, %441 : vector<16x1xf32>
    %c0_174 = arith.constant 0 : index
    %c0_175 = arith.constant 0 : index
    %443 = vector.load %arg2[%c0_174, %c0_175] : memref<16x1xf32, #tpu.memory_space<vmem>>, vector<16x1xf32>
    %cst_176 = arith.constant 0.000000e+00 : f32
    %444 = vector.broadcast %cst_176 : f32 to vector<16x1xf32>
    %445 = arith.cmpf ogt, %443, %444 : vector<16x1xf32>
    %cst_177 = arith.constant -1.000000e+09 : f32
    %446 = vector.broadcast %cst_177 : f32 to vector<16x1xf32>
    %447 = arith.select %445, %442, %446 : vector<16x1xi1>, vector<16x1xf32>
    %448 = vector.shape_cast %447 : vector<16x1xf32> to vector<2x8x1xf32>
    %449 = vector.shape_cast %427 : vector<16x32xf32> to vector<2x8x32xf32>
    %cst_178 = arith.constant dense<0xFF800000> : vector<2x1xf32>
    %450 = vector.multi_reduction <maximumf>, %448, %cst_178 [1] : vector<2x8x1xf32> to vector<2x1xf32>
    %451 = vector.shape_cast %450 : vector<2x1xf32> to vector<2x1x1xf32>
    %452 = vector.broadcast %451 : vector<2x1x1xf32> to vector<2x8x1xf32>
    %453 = arith.subf %448, %452 : vector<2x8x1xf32>
    %454 = math.exp %453 : vector<2x8x1xf32>
    %cst_179 = arith.constant dense<0.000000e+00> : vector<2x1xf32>
    %455 = vector.multi_reduction <add>, %454, %cst_179 [1] : vector<2x8x1xf32> to vector<2x1xf32>
    %456 = vector.shape_cast %455 : vector<2x1xf32> to vector<2x1x1xf32>
    %457 = tpu.reciprocal %456 {approx = true} : vector<2x1x1xf32> -> vector<2x1x1xf32>
    %458 = vector.broadcast %457 : vector<2x1x1xf32> to vector<2x8x1xf32>
    %459 = arith.mulf %454, %458 : vector<2x8x1xf32>
    %460 = vector.broadcast %459 : vector<2x8x1xf32> to vector<2x8x32xf32>
    %461 = arith.mulf %449, %460 : vector<2x8x32xf32>
    %cst_180 = arith.constant dense<0.000000e+00> : vector<2x32xf32>
    %462 = vector.multi_reduction <add>, %461, %cst_180 [1] : vector<2x8x32xf32> to vector<2x32xf32>
    %c0_181 = arith.constant 0 : index
    %c0_182 = arith.constant 0 : index
    %463 = vector.load %arg21[%c0_181, %c0_182] : memref<1x32xf32, #tpu.memory_space<vmem>>, vector<1x32xf32>
    %464 = vector.broadcast %463 : vector<1x32xf32> to vector<2x32xf32>
    %465 = arith.mulf %462, %464 : vector<2x32xf32>
    %cst_183 = arith.constant dense<0.000000e+00> : vector<2xf32>
    %466 = vector.multi_reduction <add>, %465, %cst_183 [1] : vector<2x32xf32> to vector<2xf32>
    %467 = vector.shape_cast %466 : vector<2xf32> to vector<2x1xf32>
    %c0_184 = arith.constant 0 : index
    %c0_185 = arith.constant 0 : index
    %468 = vector.load %arg22[%c0_184, %c0_185] : memref<1x1xf32, #tpu.memory_space<vmem>>, vector<1x1xf32>
    %469 = vector.broadcast %468 : vector<1x1xf32> to vector<2x1xf32>
    %470 = arith.addf %467, %469 : vector<2x1xf32>
    %471 = math.tanh %470 : vector<2x1xf32>
    %c0_186 = arith.constant 0 : index
    %c0_187 = arith.constant 0 : index
    %472 = vector.load %arg23[%c0_186, %c0_187] : memref<2x1xf32, #tpu.memory_space<vmem>>, vector<2x1xf32>
    tpu.vector_store %arg23[%c0_186, %c0_187], %471 {strides = array<i32>} : memref<2x1xf32, #tpu.memory_space<vmem>>, vector<2x1xf32>,
    return
  }
}

</mosaic_0001>

<bundles_post_ra>
// kernel: tpu_custom_call.1
= control target key start
LH: loop header
LB: loop body
LE: loop exit
PB: predicated region body
PF: predicated region fallthrough
CT: control target
= control target key end

     0   :  { %s3151_s0 = inlined_call_operand.hbm [shape: f32[16,32], index: 0, kind: input, shape index: {}]   ;;  %s3152_s1 = inlined_call_operand.hbm [shape: f32[16,16], index: 1, kind: input, shape index: {}]   ;;  %s3153_s2 = inlined_call_operand.vmem [shape: f32[16,1], index: 2, kind: input, shape index: {}]   ;;  %s3154_s3 = inlined_call_operand.hbm [shape: f32[1,32], index: 3, kind: input, shape index: {}]   ;;  %s3155_s4 = inlined_call_operand.hbm [shape: f32[1,32], index: 4, kind: input, shape index: {}]   ;;  %s3156_s5 = inlined_call_operand.vmem [shape: bf16[2,32,96], index: 5, kind: input, shape index: {}]   ;;  %s3157_s6 = inlined_call_operand.hbm [shape: f32[2,1,96], index: 6, kind: input, shape index: {}]   ;;  %s3158_s7 = inlined_call_operand.vmem [shape: f32[2,32,32], index: 7, kind: input, shape index: {}]   ;;  %s3159_s8 = inlined_call_operand.hbm [shape: f32[2,1,32], index: 8, kind: input, shape index: {}]   ;;  %s3160_s9 = inlined_call_operand.hbm [shape: f32[2,1,32], index: 9, kind: input, shape index: {}]   ;;  %s3161_s10 = inlined_call_operand.hbm [shape: f32[2,1,32], index: 10, kind: input, shape index: {}]   ;;  %s3162_s11 = inlined_call_operand.hbm [shape: bf16[2,32,64], index: 11, kind: input, shape index: {}]   ;;  %s3163_s12 = inlined_call_operand.hbm [shape: f32[2,1,64], index: 12, kind: input, shape index: {}]   ;;  %s3164_s13 = inlined_call_operand.vmem [shape: bf16[2,64,32], index: 13, kind: input, shape index: {}]   ;;  %s3165_s14 = inlined_call_operand.vmem [shape: f32[2,1,32], index: 14, kind: input, shape index: {}]   ;;  %s3166_s15 = inlined_call_operand.hbm [shape: f32[2,1,32], index: 15, kind: input, shape index: {}]   ;;  %s3167_s16 = inlined_call_operand.vmem [shape: f32[2,1,32], index: 16, kind: input, shape index: {}]   ;;  %s3168_s17 = inlined_call_operand.hbm [shape: bf16[32,128], index: 17, kind: input, shape index: {}]   ;;  %s3169_s18 = inlined_call_operand.vmem [shape: f32[1,128], index: 18, kind: input, shape index: {}]   ;;  %s3170_s19 = inlined_call_operand.vmem [shape: f32[1,128], index: 19, kind: input, shape index: {}]   ;;  %s3171_s20 = inlined_call_operand.<no memory space> [shape: f32[1,1], index: 20, kind: input, shape index: {}]   ;;  %s3172_s21 = inlined_call_operand.vmem [shape: f32[1,32], index: 21, kind: input, shape index: {}]   ;;  %s3173_s23 = inlined_call_operand.vmem [shape: f32[2,1], index: 23, kind: output, shape index: {}]   ;;  %s3174_s22 = inlined_call_operand.<no memory space> [shape: f32[1,1], index: 22, kind: input, shape index: {}]  }
   0x1   :  { %3178 = sst [smem:[#allocation30_spill]] %s3151_s0  ;;  %v28_v0 = vstv %s3171_s20  ;;  %v30_v1 = vstv %s3174_s22 }
   0x2   :  { %3179 = sst [smem:[#allocation31_spill]] %s3152_s1  ;;  %29 = vst [vmem:[#allocation2] sm:$0x1] %v28_v0 }
   0x3   :  { %3180 = sst [smem:[#allocation32_spill]] %s3153_s2  ;;  %31 = vst [vmem:[#allocation3] sm:$0x1] %v30_v1 }
   0x4   :  { %3181 = sst [smem:[#allocation33_spill]] %s3154_s3 }
   0x5   :  { %3182 = sst [smem:[#allocation34_spill]] %s3155_s4 }
   0x6   :  { %3183 = sst [smem:[#allocation35_spill]] %s3156_s5 }
   0x7   :  { %3184 = sst [smem:[#allocation36_spill]] %s3157_s6 }
   0x8   :  { %3185 = sst [smem:[#allocation37_spill]] %s3158_s7 }
   0x9   :  { %32 = vsyncpa [#allocation5], 0 }
   0xa   :  { %33 = vsyncpa [#allocation7], 0 }
   0xb   :  { %34 = vsyncpa [#allocation10], 0 }
   0xc   :  { %35 = vsyncpa [#allocation13], 0 }
   0xd   :  { %36 = vsyncpa [#allocation16], 0 }
   0xe   :  { %37 = vsyncpa [#allocation19], 0 }
   0xf   :  { %38 = vsyncpa [#allocation22], 0  ;;  %s3186_s26 = sld [smem:[#allocation31_spill]]  ;;  %s2558_s6 = smov [#allocation6]  }
  0x10   :  { %s58_s20 = sshll.u32 %s2558_s6, 4  ;;  %s3187_s22 = sld [smem:[#allocation34_spill]]  ;;  %s59_s20 = int_to_ptr.vmem [resolvable:$true] %s58_s20 }
  0x11   :  { %s2559_s29 = smov 128   ;;  %s2560_s3 = smov 8  }
  0x12   :  { %s2561_s0 = smov [#allocation9]   ;;  %s110_s25 = sshll.u32 %s3159_s8, 4  ;;  %s111_s25 = int_to_ptr.hbm [resolvable:$true] %s110_s25 }
  0x13   :  { %s85_s4 = sshll.u32 %s2561_s0, 4  ;;  %s2562_s5 = smov [#allocation12]   ;;  %s86_s4 = int_to_ptr.vmem [resolvable:$true] %s85_s4 }
  0x14   :  { %s112_s1 = sshll.u32 %s2562_s5, 4  ;;  %s136_s27 = sshll.u32 %s3161_s10, 4  ;;  %s113_s1 = int_to_ptr.vmem [resolvable:$true] %s112_s1  ;;  %s137_s27 = int_to_ptr.hbm [resolvable:$true] %s136_s27 }
  0x15   :  { %s56_s2 = sshll.u32 %s3186_s26, 4  ;;  %s2563_s7 = smov 16   ;;  %s57_s2 = int_to_ptr.hbm [resolvable:$true] %s56_s2 }
  0x16   :  { %s83_s28 = sshll.u32 %s3187_s22, 4  ;;  %s2564_s22 = smov 1   ;;  %s84_s28 = int_to_ptr.hbm [resolvable:$true] %s83_s28 }
  0x17   :  { %64 = dma.hbm_to_vmem [thread:$0]  %s57_s2, 256, %s59_s20, [#allocation7], %s2559_s29, %s2559_s29, %s2560_s3  }
  0x18   :  { %88 = dma.hbm_to_vmem [thread:$0]  %s84_s28, 16, %s86_s4, [#allocation10]  }
  0x19   :  { %118 = dma.hbm_to_vmem [thread:$0]  %s111_s25, 32, %s113_s1, [#allocation13], %s2563_s7, %s2563_s7, %s2564_s22  }
  0x1a   :  { %s2565_s2 = smov [#allocation15]   ;;  %s162_s8 = sshll.u32 %s3163_s12, 4  ;;  %s163_s8 = int_to_ptr.hbm [resolvable:$true] %s162_s8 }
  0x1b   :  { %s138_s20 = sshll.u32 %s2565_s2, 4  ;;  %s3188_s30 = sld [smem:[#allocation30_spill]]  ;;  %s139_s20 = int_to_ptr.vmem [resolvable:$true] %s138_s20 }
  0x1c   :  { %144 = dma.hbm_to_vmem [thread:$0]  %s137_s27, 32, %s139_s20, [#allocation16], %s2563_s7, %s2563_s7, %s2564_s22  }
  0x1d   :  { %s2566_s5 = smov [#allocation18]   ;;  %s2567_s25 = smov [#allocation4]  }
  0x1e   :  { %s164_s26 = sshll.u32 %s2566_s5, 4  ;;  %s45_s12 = sshll.u32 %s2567_s25, 4  ;;  %s165_s26 = int_to_ptr.vmem [resolvable:$true] %s164_s26  ;;  %s46_s12 = int_to_ptr.vmem [resolvable:$true] %s45_s12 }
  0x1f   :  { %170 = dma.hbm_to_vmem [thread:$0]  %s163_s8, 32, %s165_s26, [#allocation19], %s2563_s7, %s2563_s7, %s2564_s22  }
  0x20   :  { %s3189_s2 = sld [smem:[#allocation33_spill]]  ;;  %s2568_s4 = smov [#allocation8]  }
  0x21   :  { %s43_s24 = sshll.u32 %s3188_s30, 4  ;;  %s3190_s0 = sld [smem:[#allocation36_spill]]  ;;  %s44_s24 = int_to_ptr.hbm [resolvable:$true] %s43_s24 }
  0x22   :  { %51 = dma.hbm_to_vmem [thread:$0]  %s44_s24, 256, %s46_s12, [#allocation5], %s2559_s29, %s2559_s29, %s2560_s3  }
  0x23   :  { %s74_s30 = sshll.u32 %s2568_s4, 4  ;;  %s2569_s8 = smov [#allocation11]   ;;  %s75_s30 = int_to_ptr.vmem [resolvable:$true] %s74_s30 }
  0x24   :  { %s97_s5 = sshll.u32 %s2569_s8, 4  ;;  %s123_s1 = sshll.u32 %s3160_s9, 4  ;;  %s98_s5 = int_to_ptr.vmem [resolvable:$true] %s97_s5  ;;  %s124_s1 = int_to_ptr.hbm [resolvable:$true] %s123_s1 }
  0x25   :  { %s149_s24 = sshll.u32 %s3162_s11, 4  ;;  %s2570_s12 = smov [#allocation14]   ;;  %s150_s24 = int_to_ptr.hbm [resolvable:$true] %s149_s24 }
  0x26   :  { %s72_s28 = sshll.u32 %s3189_s2, 4  ;;  %s125_s6 = sshll.u32 %s2570_s12, 4  ;;  %s73_s28 = int_to_ptr.hbm [resolvable:$true] %s72_s28  ;;  %s126_s6 = int_to_ptr.vmem [resolvable:$true] %s125_s6 }
  0x27   :  { %s95_s10 = sshll.u32 %s3190_s0, 4  ;;  %s2571_s2 = smov [#allocation17]   ;;  %s96_s10 = int_to_ptr.hbm [resolvable:$true] %s95_s10 }
  0x28   :  { %77 = dma.hbm_to_vmem [thread:$0]  %s73_s28, 16, %s75_s30, [#allocation7]  }
  0x29   :  { %103 = dma.hbm_to_vmem [thread:$0]  %s96_s10, 32, %s98_s5, [#allocation10], %s2563_s7, %s2563_s7, %s2564_s22  }
  0x2a   :  { %131 = dma.hbm_to_vmem [thread:$0]  %s124_s1, 32, %s126_s6, [#allocation13], %s2563_s7, %s2563_s7, %s2564_s22  }
  0x2b   :  { %s151_s9 = sshll.u32 %s2571_s2, 4  ;;  %s2572_s28 = smov 64   ;;  %s152_s9 = int_to_ptr.vmem [resolvable:$true] %s151_s9 }
  0x2c   :  { %s2573_s27 = smov 4   ;;  %s179_s11 = sshll.u32 %s3166_s15, 4  ;;  %s180_s11 = int_to_ptr.hbm [resolvable:$true] %s179_s11 }
  0x2d   :  { %157 = dma.hbm_to_vmem [thread:$0]  %s150_s24, 512, %s152_s9, [#allocation16], %s2572_s28, %s2572_s28, %s2573_s27  }
  0x2e   :  { %s2574_s10 = smov [#allocation20]   ;;  %s194_s5 = sshll.u32 %s3168_s17, 4  ;;  %s195_s5 = int_to_ptr.hbm [resolvable:$true] %s194_s5 }
  0x2f   :  { %s181_s4 = sshll.u32 %s2574_s10, 4  ;;  %s2575_s26 = smov [#allocation21]   ;;  %s182_s4 = int_to_ptr.vmem [resolvable:$true] %s181_s4 }
  0x30   :  { %187 = dma.hbm_to_vmem [thread:$0]  %s180_s11, 32, %s182_s4, [#allocation19], %s2563_s7, %s2563_s7, %s2564_s22  }
  0x31   :  { %s196_s25 = sshll.u32 %s2575_s26, 4  ;;  %s197_s25 = int_to_ptr.vmem [resolvable:$true] %s196_s25 }
  0x32   :  { %202 = dma.hbm_to_vmem [thread:$0]  %s195_s5, 256, %s197_s25, [#allocation22], %s2572_s28, %s2572_s28, %s2573_s27  }
  0x33   :  { %2544 = dma.done.wait [#allocation5], 256  }
  0x34   :  { %2545 = vsyncadd [#allocation5], 4294967040 }
  0x35   :  { %2546 = dma.done.wait [#allocation7], 272  }
  0x36   :  { %2547 = vsyncadd [#allocation7], 4294967024 }
  0x37   :  { %2548 = dma.done.wait [#allocation10], 48  }
  0x38   :  { %2549 = vsyncadd [#allocation10], 4294967248 }
  0x39   :  { %2550 = dma.done.wait [#allocation13], 64  }
  0x3a   :  { %2551 = vsyncadd [#allocation13], 4294967232 }
  0x3b   :  { %2552 = dma.done.wait [#allocation16], 544  }
  0x3c   :  { %2553 = vsyncadd [#allocation16], 4294966752 }
  0x3d   :  { %2554 = dma.done.wait [#allocation19], 64  }
  0x3e   :  { %2555 = vsyncadd [#allocation19], 4294967232 }
  0x3f   :  { %2556 = dma.done.wait [#allocation22], 256  }
  0x40   :  { %2557 = vsyncadd [#allocation22], 4294967040  ;;  %vm268_vm0 = vcmask 261120   ;;  %v264_v2 = vld [vmem:[#allocation4] sm:$0xff]  ;;  %v265_v3 = vld [vmem:[#allocation4 + $0x8] sm:$0xff]  ;;  %v2576_v6 = vmov 32.0  }
  0x41   :  { %v269_v4 = vsel %vm268_vm0, %v264_v2, 0.0  ;;  %v272_v5 = vsel %vm268_vm0, %v265_v3, 0.0  ;;  %2146 = vrcp.f32 %v2576_v6  ;;  %s3191_s7 = sld [smem:[#allocation35_spill]]  ;;  %v2123_v44 = vld [vmem:[#allocation8] ss:$0 sm:$0xff]  ;;  %s2577_s29 = smov 96  }
  0x42   :  { %270 = vadd.xlane.f32.xlu0 %v269_v4  ;;  %v2124_v49 = vld [vmem:[#allocation9] ss:$0 sm:$0xff]  ;;  %v2125_v55 = vld [vmem:[#allocation11] ss:$0 sm:$0xff]  ;;  %vm376_vm8 = vcmask 64512   ;;  %v2808_v63 = vld [vmem:[#allocation6] sm:$0xff] }
  0x43   :  { %vm401_vm9 = vcmask 130048   ;;  %v2812_v4 = vld [vmem:[#allocation6 + $0x8] sm:$0xff]  ;;  %s2578_s3 = smov 80   ;;  %s2579_s24 = smov 88   ;;  %vm523_vm10 = vcmask 1043456  }
  0x44   :  { %s2580_s12 = smov 120   ;;  %s2581_s6 = smov 72  }
  0x45   :  { %s2582_s2 = smov 112   ;;  %s2583_s9 = smov 104  }
  0x46   :  { %s3192_s0 = sld [smem:[#allocation37_spill]]  ;;  %s2584_s11 = smov 56  }
  0x47   :  { %v2147_v7 = vpop.eup %2146  ;;  %v2074_v23 = vld [vmem:[%s3191_s7 + $0x8] sm:$0xff]  ;;  %v2073_v25 = vld [vmem:[%s3191_s7] sm:$0xff]  ;;  %s2585_s10 = smov 40   ;;  %s2586_s4 = smov 48  }
  0x48   :  { %v276_v8 = vmul.f32 32.0, %v2147_v7  ;;  %vm280_vm1 = vweird.f32 %v2147_v7  ;;  %360 = vmatpush.bf16.msra.mxu0 %v2074_v23 }
  0x4a   :  { %273 = vadd.xlane.f32.xlu0 %v272_v5  ;;  %v277_v9 = vsub.f32 1.0, %v276_v8 }
  0x4c   :  { %v278_v10 = vmul.f32 %v2147_v7, %v277_v9  ;;  %361 = vmatpush.bf16.msra.mxu0 %v2073_v25 }
  0x4e   :  { %v279_v11 = vadd.f32 %v2147_v7, %v278_v10 }
  0x50   :  { %v2780_v12 = vsel %vm280_vm1, %v2147_v7, %v279_v11 }
  0xb5   :  { %v271_v13 = vpop.xlane.xlu0 %270 }
  0xb6   :  { %v282_v14 = vmul.f32 %v2780_v12, %v271_v13 }
  0xb8   :  { %v284_v15 = vsub.f32 %v264_v2, %v282_v14 }
  0xba   :  { %v286_v16 = vmul.f32 %v284_v15, %v284_v15 }
  0xbc   :  { %v288_v17 = vsel %vm268_vm0, %v286_v16, 0.0 }
  0xbd   :  { %289 = vadd.xlane.f32.xlu1 %v288_v17  ;;  %v274_v18 = vpop.xlane.xlu0 %273 }
  0xbe   :  { %v283_v19 = vmul.f32 %v2780_v12, %v274_v18 }
  0xc0   :  { %v285_v20 = vsub.f32 %v265_v3, %v283_v19  ;;  %v368_v19 = vld [vmem:[%s3192_s0] sm:$0xff] }
  0xc2   :  { %v287_v21 = vmul.f32 %v285_v20, %v285_v20 }
  0xc4   :  { %v291_v22 = vsel %vm268_vm0, %v287_v21, 0.0 }
  0xc5   :  { %292 = vadd.xlane.f32.xlu1 %v291_v22 }
 0x130   :  { %v290_v24 = vpop.xlane.xlu1 %289 }
 0x131   :  { %v294_v26 = vmul.f32 %v290_v24, %v2780_v12 }
 0x133   :  { %v296_v27 = vadd.f32 1e-12, %v294_v26 }
 0x135   :  { %2148 = vrsqrt.f32 %v296_v27  ;;  %vm304_vm3 = vweird.f32 %v296_v27 }
 0x138   :  { %v293_v28 = vpop.xlane.xlu1 %292 }
 0x139   :  { %v295_v29 = vmul.f32 %v293_v28, %v2780_v12 }
 0x13b   :  { %v2149_v30 = vpop.eup %2148  ;;  %v297_v31 = vadd.f32 1e-12, %v295_v29 }
 0x13c   :  { %v299_v32 = vmul.f32 %v2149_v30, %v296_v27  ;;  %vm305_vm2 = vweird.f32 %v2149_v30 }
 0x13d   :  { %2150 = vrsqrt.f32 %v297_v31  ;;  %vm306_vm4 = vmor %vm304_vm3, %vm305_vm2  ;;  %vm314_vm6 = vweird.f32 %v297_v31 }
 0x13e   :  { %v300_v33 = vmul.f32 %v2149_v30, %v299_v32 }
 0x140   :  { %v301_v34 = vmul.f32 0.5, %v300_v33 }
 0x142   :  { %v302_v35 = vsub.f32 1.5, %v301_v34 }
 0x143   :  { %v2151_v36 = vpop.eup %2150 }
 0x144   :  { %v303_v37 = vmul.f32 %v2149_v30, %v302_v35  ;;  %v309_v38 = vmul.f32 %v2151_v36, %v297_v31  ;;  %vm315_vm5 = vweird.f32 %v2151_v36 }
 0x145   :  { %vm316_vm7 = vmor %vm314_vm6, %vm315_vm5 }
 0x146   :  { %v310_v39 = vmul.f32 %v2151_v36, %v309_v38  ;;  %v307_v40 = vsel %vm306_vm4, %v2149_v30, %v303_v37 }
 0x147   :  { %v318_v43 = vmul.f32 %v307_v40, %v284_v15 }
 0x148   :  { %v311_v41 = vmul.f32 0.5, %v310_v39 }
 0x149   :  { %v323_v48 = vmul.f32 %v2123_v44, %v318_v43 }
 0x14a   :  { %v312_v42 = vsub.f32 1.5, %v311_v41 }
 0x14b   :  { %v2794_v51 = vadd.f32 %v2124_v49, %v323_v48 }
 0x14c   :  { %v313_v45 = vmul.f32 %v2151_v36, %v312_v42 }
 0x14e   :  { %v317_v46 = vsel %vm316_vm7, %v2151_v36, %v313_v45 }
 0x14f   :  { %v319_v47 = vmul.f32 %v317_v46, %v285_v20  ;;  %v446_v20 = vpack.c.bf16 %v368_v19, %v368_v19 }
 0x151   :  { %v324_v50 = vmul.f32 %v2123_v44, %v319_v47  ;;  %v545_v21 = vsel %vm523_vm10, %v446_v20, 0 }
 0x153   :  { %v2796_v52 = vadd.f32 %v2124_v49, %v324_v50 }
 0x155   :  { %v334_v53 = vpack.c.bf16 %v2796_v52, %v2794_v51 }
 0x157   :  { %1956 = vmatmul.msk.bf16.vlgmr.msra.gmra.mxu0 %vm268_vm0, %v334_v53 }
 0x1d4   :  { %v363_v54 = vpop.f32.mrf.mxu0 }
 0x1d5   :  { %v364_v57 = vadd.f32 %v2125_v55, %v363_v54 }
 0x1dc   :  { %v365_v56 = vpop.f32.mrf.mxu0 }
 0x1dd   :  { %v366_v58 = vadd.f32 %v2125_v55, %v365_v56 }
 0x1df   :  { %v2801_v59 = vpack.c.bf16 %v366_v58, %v364_v57 }
 0x1e1   :  { %374 = vrot.lane.b32.xlu2 %v2801_v59, %s2577_s29 }
 0x23b   :  { %v375_v60 = vpop.permute.xlu2 %374 }
 0x23c   :  { %v381_v61 = vsel %vm376_vm8, %v375_v60, 0 }
 0x23d   :  { %390 = vmatpush.bf16.xpose.msra.mxu1 %v381_v61 }
 0x244   :  { %1957 = vmatmul.msk.bf16.vlgmr.msra.gmra.mxu1 %vm376_vm8, %v2801_v59 }
 0x245   :  { %554 = vmatpush.bf16.msrb.mxu1 %v545_v21 }
 0x2c1   :  { %v392_v62 = vpop.f32.mrf.mxu1 }
 0x2c2   :  { %v397_v0 = vmul.f32 0.35355338, %v392_v62 }
 0x2c4   :  { %v399_v1 = vadd.f32 %v397_v0, %v2808_v63 }
 0x2c6   :  { %v402_v2 = vsel %vm401_vm9, %v399_v1, -inf }
 0x2c7   :  { %403 = vmax.xlane.f32.xlu2 %v402_v2 }
 0x2c9   :  { %v394_v3 = vpop.f32.mrf.mxu1 }
 0x2ca   :  { %v398_v5 = vmul.f32 0.35355338, %v394_v3 }
 0x2cc   :  { %v400_v6 = vadd.f32 %v398_v5, %v2812_v4 }
 0x2ce   :  { %v405_v7 = vsel %vm401_vm9, %v400_v6, -inf }
 0x2cf   :  { %406 = vmax.xlane.f32.xlu0 %v405_v7 }
 0x2df   :  { %563 = vrot.lane.b32.xlu2 %v2801_v59, %s2578_s3 }
 0x33a   :  { %v404_v8 = vpop.xlane.xlu2 %403 }
 0x33b   :  { %v408_v9 = vsub.f32 %v399_v1, %v404_v8 }
 0x33d   :  { %v410_v10 = vmul.f32 1.442695, %v408_v9 }
 0x33f   :  { %2152 = vpow2.f32 %v410_v10 }
 0x342   :  { %v407_v11 = vpop.xlane.xlu0 %406  ;;  %v564_v29 = vpop.permute.xlu2 %563 }
 0x343   :  { %v409_v13 = vsub.f32 %v400_v6, %v407_v11  ;;  %v569_v33 = vsel %vm376_vm8, %v564_v29, 0 }
 0x345   :  { %v2153_v14 = vpop.eup %2152  ;;  %v412_v15 = vmul.f32 1.442695, %v409_v13 }
 0x346   :  { %v414_v16 = vsel %vm401_vm9, %v2153_v14, 0.0 }
 0x347   :  { %2154 = vpow2.f32 %v412_v15  ;;  %415 = vadd.xlane.f32.xlu1 %v414_v16 }
 0x34d   :  { %v2155_v17 = vpop.eup %2154 }
 0x34e   :  { %v417_v18 = vsel %vm401_vm9, %v2155_v17, 0.0 }
 0x34f   :  { %418 = vadd.xlane.f32.xlu0 %v417_v18 }
 0x360   :  { %425 = vrot.lane.b32.xlu1 %v2801_v59, %s2572_s28 }
 0x363   :  { %449 = vrot.lane.b32.xlu0 %v2801_v59, %s2579_s24 }
 0x368   :  { %447 = vrot.lane.b32.xlu1 %v2801_v59, %s2580_s12 }
 0x36b   :  { %658 = vrot.lane.b32.xlu0 %v2801_v59, %s2581_s6 }
 0x370   :  { %561 = vrot.lane.b32.xlu1 %v2801_v59, %s2582_s2 }
 0x373   :  { %656 = vrot.lane.b32.xlu0 %v2801_v59, %s2583_s9 }
 0x3ba   :  { %v416_v23 = vpop.xlane.xlu1 %415 }
 0x3c2   :  { %v419_v22 = vpop.xlane.xlu0 %418 }
 0x3c3   :  { %2156 = vrcp.f32 %v419_v22 }
 0x3c4   :  { %2158 = vrcp.f32 %v416_v23 }
 0x3c9   :  { %v2157_v24 = vpop.eup %2156 }
 0x3ca   :  { %v2159_v25 = vpop.eup %2158  ;;  %v423_v26 = vmul.f32 %v2157_v24, %v2155_v17 }
 0x3cb   :  { %v422_v28 = vmul.f32 %v2159_v25, %v2153_v14 }
 0x3cd   :  { %v424_v30 = vpack.c.bf16 %v423_v26, %v422_v28 }
 0x3d2   :  { %v426_v27 = vpop.permute.xlu1 %425 }
 0x3d3   :  { %438 = vmatpush.bf16.msra.mxu2 %v426_v27 }
 0x3d5   :  { %v450_v31 = vpop.permute.xlu0 %449 }
 0x3d6   :  { %1958 = vmatmul.msk.bf16.vlgmr.msra.gmra.mxu2 %vm401_vm9, %v424_v30  ;;  %v455_v32 = vsel %vm376_vm8, %v450_v31, 0 }
 0x3d7   :  { %464 = vmatpush.bf16.xpose.msra.mxu3 %v455_v32 }
 0x3da   :  { %v448_v34 = vpop.permute.xlu1 %447 }
 0x3dd   :  { %v659_v35 = vpop.permute.xlu0 %658 }
 0x3de   :  { %v664_v36 = vsel %vm376_vm8, %v659_v35, 0  ;;  %1959 = vmatmul.msk.bf16.vlgmr.msra.gmra.mxu3 %vm376_vm8, %v448_v34 }
 0x3df   :  { %578 = vmatpush.bf16.xpose.msrb.mxu3 %v569_v33  ;;  %673 = vmatpush.bf16.xpose.msra.mxu1 %v664_v36 }
 0x3e2   :  { %v562_v37 = vpop.permute.xlu1 %561 }
 0x3e5   :  { %v657_v53 = vpop.permute.xlu0 %656 }
 0x3ee   :  { %1963 = vmatmul.msk.bf16.vlgmr.msrb.gmra.mxu3 %vm376_vm8, %v562_v37 }
 0x459   :  { %v440_v38 = vpop.f32.mrf.mxu2 }
 0x461   :  { %v442_v39 = vpop.f32.mrf.mxu2  ;;  %v466_v40 = vpop.f32.mrf.mxu3 }
 0x462   :  { %v445_v41 = vpack.c.bf16 %v442_v39, %v440_v38  ;;  %v471_v42 = vmul.f32 0.35355338, %v466_v40 }
 0x464   :  { %1962 = vmatmul.msk.bf16.vlgmr.msrb.gmra.mxu1 %vm376_vm8, %v445_v41  ;;  %v473_v43 = vadd.f32 %v471_v42, %v2808_v63 }
 0x466   :  { %v475_v44 = vsel %vm401_vm9, %v473_v43, -inf }
 0x467   :  { %476 = vmax.xlane.f32.xlu1 %v475_v44 }
 0x469   :  { %v468_v45 = vpop.f32.mrf.mxu3 }
 0x46a   :  { %v472_v46 = vmul.f32 0.35355338, %v468_v45 }
 0x46c   :  { %v474_v47 = vadd.f32 %v472_v46, %v2812_v4 }
 0x46e   :  { %v478_v48 = vsel %vm401_vm9, %v474_v47, -inf }
 0x46f   :  { %479 = vmax.xlane.f32.xlu0 %v478_v48  ;;  %v369_v48 = vld [vmem:[%s3192_s0 + $0x8] sm:$0xff] }
 0x471   :  { %v580_v49 = vpop.f32.mrf.mxu3 }
 0x472   :  { %v585_v50 = vmul.f32 0.35355338, %v580_v49 }
 0x474   :  { %1966 = vmatmul.msk.bf16.vlgmr.msra.gmra.mxu1 %vm376_vm8, %v657_v53  ;;  %v587_v54 = vadd.f32 %v585_v50, %v2808_v63  ;;  %v519_v50 = vpack.c.bf16 %v369_v48, %v369_v48 }
 0x476   :  { %v589_v55 = vsel %vm401_vm9, %v587_v54, -inf  ;;  %v525_v53 = vsel %vm523_vm10, %v519_v50, 0 }
 0x477   :  { %590 = vmax.xlane.f32.xlu0 %v589_v55  ;;  %534 = vmatpush.bf16.msrb.mxu0 %v525_v53 }
 0x479   :  { %v582_v5 = vpop.f32.mrf.mxu3 }
 0x47a   :  { %v586_v8 = vmul.f32 0.35355338, %v582_v5 }
 0x47c   :  { %v588_v15 = vadd.f32 %v586_v8, %v2812_v4 }
 0x47e   :  { %v592_v19 = vsel %vm401_vm9, %v588_v15, -inf }
 0x4da   :  { %v477_v2 = vpop.xlane.xlu1 %476 }
 0x4db   :  { %v481_v7 = vsub.f32 %v473_v43, %v477_v2 }
 0x4dd   :  { %v483_v10 = vmul.f32 1.442695, %v481_v7 }
 0x4e1   :  { %v2850_v56 = vpop.f32.mrf.mxu1 }
 0x4e2   :  { %v480_v57 = vpop.xlane.xlu0 %479 }
 0x4e3   :  { %v482_v58 = vsub.f32 %v474_v47, %v480_v57 }
 0x4e5   :  { %v485_v60 = vmul.f32 1.442695, %v482_v58 }
 0x4e7   :  { %2160 = vpow2.f32 %v485_v60 }
 0x4e8   :  { %2162 = vpow2.f32 %v483_v10 }
 0x4e9   :  { %v2852_v61 = vpop.f32.mrf.mxu1 }
 0x4ea   :  { %v591_v13 = vpop.xlane.xlu0 %590 }
 0x4eb   :  { %v595_v17 = vsub.f32 %v587_v54, %v591_v13  ;;  %v371_v13 = vld [vmem:[%s3192_s0 + $0x18] sm:$0xff] }
 0x4ed   :  { %v2161_v62 = vpop.eup %2160  ;;  %v597_v20 = vmul.f32 1.442695, %v595_v17 }
 0x4ee   :  { %v490_v0 = vsel %vm401_vm9, %v2161_v62, 0.0  ;;  %v2163_v21 = vpop.eup %2162 }
 0x4ef   :  { %491 = vadd.xlane.f32.xlu0 %v490_v0  ;;  %2164 = vpow2.f32 %v597_v20  ;;  %v487_v22 = vsel %vm401_vm9, %v2163_v21, 0.0 }
 0x4f1   :  { %v675_v1 = vpop.f32.mrf.mxu1 }
 0x4f2   :  { %v680_v3 = vmul.f32 0.35355338, %v675_v1 }
 0x4f4   :  { %v682_v6 = vadd.f32 %v680_v3, %v2808_v63 }
 0x4f5   :  { %v2862_v23 = vpop.eup %2164 }
 0x4f6   :  { %v684_v9 = vsel %vm401_vm9, %v682_v6, -inf  ;;  %v601_v24 = vsel %vm401_vm9, %v2862_v23, 0.0 }
 0x4f7   :  { %685 = vmax.xlane.f32.xlu2 %v684_v9 }
 0x4f9   :  { %v677_v11 = vpop.f32.mrf.mxu1 }
 0x4fa   :  { %v681_v14 = vmul.f32 0.35355338, %v677_v11 }
 0x4fc   :  { %v683_v16 = vadd.f32 %v681_v14, %v2812_v4  ;;  %v728_v14 = vpack.c.bf16 %v371_v13, %v371_v13  ;;  %v2127_v13 = vld [vmem:[#allocation14] ss:$0 sm:$0xff] }
 0x4fe   :  { %v687_v18 = vsel %vm401_vm9, %v683_v16, -inf }
 0x4ff   :  { %688 = vmax.xlane.f32.xlu1 %v687_v18  ;;  %593 = vmax.xlane.f32.xlu2 %v592_v19 }
 0x507   :  { %488 = vadd.xlane.f32.xlu1 %v487_v22 }
 0x50f   :  { %602 = vadd.xlane.f32.xlu1 %v601_v24 }
 0x517   :  { %498 = vrot.lane.b32.xlu2 %v2801_v59, %s2584_s11 }
 0x562   :  { %v492_v33 = vpop.xlane.xlu0 %491 }
 0x56a   :  { %v686_v25 = vpop.xlane.xlu2 %685 }
 0x56b   :  { %v690_v26 = vsub.f32 %v682_v6, %v686_v25 }
 0x56d   :  { %v692_v27 = vmul.f32 1.442695, %v690_v26 }
 0x56f   :  { %2166 = vpow2.f32 %v692_v27 }
 0x572   :  { %v689_v28 = vpop.xlane.xlu1 %688  ;;  %v594_v29 = vpop.xlane.xlu2 %593 }
 0x573   :  { %v596_v30 = vsub.f32 %v588_v15, %v594_v29  ;;  %v691_v34 = vsub.f32 %v683_v16, %v689_v28  ;;  %v733_v15 = vsel %vm523_vm10, %v728_v14, 0  ;;  %v370_v16 = vld [vmem:[%s3192_s0 + $0x10] sm:$0xff] }
 0x574   :  { %v633_v17 = vpack.c.bf16 %v370_v16, %v370_v16 }
 0x575   :  { %v2167_v31 = vpop.eup %2166  ;;  %v599_v32 = vmul.f32 1.442695, %v596_v30  ;;  %v694_v36 = vmul.f32 1.442695, %v691_v34 }
 0x576   :  { %v696_v35 = vsel %vm401_vm9, %v2167_v31, 0.0  ;;  %v638_v18 = vsel %vm523_vm10, %v633_v17, 0  ;;  %v2128_v17 = vld [vmem:[#allocation15] ss:$0 sm:$0xff] }
 0x577   :  { %697 = vadd.xlane.f32.xlu1 %v696_v35  ;;  %2168 = vpow2.f32 %v599_v32  ;;  %647 = vmatpush.bf16.msra.mxu0 %v638_v18  ;;  %v2126_v32 = vld [vmem:[#allocation12] ss:$0 sm:$0xff] }
 0x578   :  { %2170 = vrcp.f32 %v492_v33 }
 0x57a   :  { %v489_v37 = vpop.xlane.xlu1 %488  ;;  %v499_v38 = vpop.permute.xlu2 %498 }
 0x57b   :  { %2172 = vrcp.f32 %v489_v37  ;;  %511 = vmatpush.bf16.msrb.mxu2 %v499_v38 }
 0x57c   :  { %2174 = vpow2.f32 %v694_v36 }
 0x57d   :  { %v2169_v39 = vpop.eup %2168 }
 0x57e   :  { %v2171_v40 = vpop.eup %2170  ;;  %v604_v41 = vsel %vm401_vm9, %v2169_v39, 0.0 }
 0x57f   :  { %605 = vadd.xlane.f32.xlu0 %v604_v41  ;;  %v496_v43 = vmul.f32 %v2171_v40, %v2161_v62 }
 0x581   :  { %v2173_v42 = vpop.eup %2172 }
 0x582   :  { %v495_v44 = vmul.f32 %v2173_v42, %v2163_v21  ;;  %v2175_v45 = vpop.eup %2174  ;;  %v603_v49 = vpop.xlane.xlu1 %602 }
 0x583   :  { %v699_v47 = vsel %vm401_vm9, %v2175_v45, 0.0 }
 0x584   :  { %v497_v46 = vpack.c.bf16 %v496_v43, %v495_v44 }
 0x586   :  { %1960 = vmatmul.msk.bf16.vlgmr.msrb.gmra.mxu2 %vm401_vm9, %v497_v46 }
 0x587   :  { %700 = vadd.xlane.f32.xlu0 %v699_v47 }
 0x590   :  { %707 = vrot.lane.b32.xlu1 %v2801_v59, %s2585_s10 }
 0x59b   :  { %612 = vrot.lane.b32.xlu0 %v2801_v59, %s2586_s4 }
 0x5ea   :  { %v698_v55 = vpop.xlane.xlu1 %697 }
 0x5eb   :  { %2176 = vrcp.f32 %v698_v55  ;;  %v2075_v55 = vld [vmem:[#allocation17] sm:$0xff] }
 0x5f1   :  { %v2177_v58 = vpop.eup %2176 }
 0x5f2   :  { %v606_v54 = vpop.xlane.xlu0 %605  ;;  %v704_v0 = vmul.f32 %v2177_v58, %v2167_v31 }
 0x5fa   :  { %v701_v57 = vpop.xlane.xlu0 %700 }
 0x5fb   :  { %2178 = vrcp.f32 %v701_v57 }
 0x5fc   :  { %2180 = vrcp.f32 %v606_v54 }
 0x5fd   :  { %2182 = vrcp.f32 %v603_v49 }
 0x601   :  { %v2179_v60 = vpop.eup %2178 }
 0x602   :  { %v708_v62 = vpop.permute.xlu1 %707  ;;  %v705_v59 = vmul.f32 %v2179_v60, %v2175_v45  ;;  %v2181_v2 = vpop.eup %2180 }
 0x603   :  { %720 = vmatpush.bf16.msra.mxu3 %v708_v62  ;;  %v2183_v5 = vpop.eup %2182  ;;  %v610_v6 = vmul.f32 %v2181_v2, %v2169_v39 }
 0x604   :  { %v706_v1 = vpack.c.bf16 %v705_v59, %v704_v0  ;;  %v609_v7 = vmul.f32 %v2183_v5, %v2862_v23 }
 0x606   :  { %1967 = vmatmul.msk.bf16.vlgmr.msra.gmra.mxu3 %vm401_vm9, %v706_v1  ;;  %v611_v9 = vpack.c.bf16 %v610_v6, %v609_v7 }
 0x609   :  { %v513_v3 = vpop.f32.mrf.mxu2 }
 0x60d   :  { %v613_v8 = vpop.permute.xlu0 %612 }
 0x60e   :  { %625 = vmatpush.bf16.msra.mxu2 %v613_v8 }
 0x611   :  { %v515_v10 = vpop.f32.mrf.mxu2  ;;  %1964 = vmatmul.msk.bf16.vlgmr.msra.gmra.mxu2 %vm401_vm9, %v611_v9 }
 0x612   :  { %v518_v11 = vpack.c.bf16 %v515_v10, %v513_v3  ;;  %742 = vmatpush.bf16.msrb.mxu2 %v733_v15 }
 0x614   :  { %1961 = vmatmul.msk.bf16.vlgmr.msrb.gmra.mxu0 %vm376_vm8, %v518_v11 }
 0x689   :  { %v722_v19 = vpop.f32.mrf.mxu3 }
 0x691   :  { %v724_v20 = vpop.f32.mrf.mxu3  ;;  %v536_v25 = vpop.f32.mrf.mxu0 }
 0x692   :  { %v727_v21 = vpack.c.bf16 %v724_v20, %v722_v19  ;;  %v557_v27 = vadd.f32 %v2850_v56, %v536_v25 }
 0x694   :  { %v627_v22 = vpop.f32.mrf.mxu2  ;;  %1968 = vmatmul.msk.bf16.vlgmr.msrb.gmra.mxu2 %vm376_vm8, %v727_v21 }
 0x699   :  { %v538_v26 = vpop.f32.mrf.mxu0 }
 0x69a   :  { %v559_v34 = vadd.f32 %v2852_v61, %v538_v26 }
 0x69c   :  { %v629_v23 = vpop.f32.mrf.mxu2 }
 0x69d   :  { %v632_v24 = vpack.c.bf16 %v629_v23, %v627_v22 }
 0x69f   :  { %1965 = vmatmul.msk.bf16.vlgmr.msra.gmra.mxu0 %vm376_vm8, %v632_v24  ;;  %v2129_v24 = vld [vmem:[#allocation18] ss:$0 sm:$0xff] }
 0x717   :  { %v744_v28 = vpop.f32.mrf.mxu2 }
 0x71c   :  { %v649_v29 = vpop.f32.mrf.mxu0 }
 0x71d   :  { %v654_v30 = vadd.f32 %v649_v29, %v557_v27 }
 0x71f   :  { %v749_v31 = vadd.f32 %v744_v28, %v654_v30  ;;  %v746_v39 = vpop.f32.mrf.mxu2 }
 0x721   :  { %v751_v33 = vadd.f32 %v749_v31, %v2794_v51 }
 0x723   :  { %v757_v35 = vadd.f32 %v2126_v32, %v751_v33 }
 0x724   :  { %v651_v36 = vpop.f32.mrf.mxu0 }
 0x725   :  { %v655_v37 = vadd.f32 %v651_v36, %v559_v34  ;;  %v761_v38 = vsel %vm268_vm0, %v757_v35, 0.0 }
 0x726   :  { %762 = vadd.xlane.f32.xlu2 %v761_v38 }
 0x727   :  { %v750_v40 = vadd.f32 %v746_v39, %v655_v37 }
 0x729   :  { %v752_v41 = vadd.f32 %v750_v40, %v2796_v52  ;;  %v2076_v52 = vld [vmem:[#allocation17 + $0x8] sm:$0xff] }
 0x72a   :  { %845 = vmatpush.bf16.msrb.mxu0 %v2076_v52 }
 0x72b   :  { %v758_v56 = vadd.f32 %v2126_v32, %v752_v41 }
 0x72d   :  { %v764_v42 = vsel %vm268_vm0, %v758_v56, 0.0 }
 0x72e   :  { %765 = vadd.xlane.f32.xlu0 %v764_v42  ;;  %846 = vmatpush.bf16.msrb.mxu0 %v2075_v55  ;;  %v2080_v42 = vld [vmem:[%s3164_s13 + $0x18] sm:$0xff] }
 0x72f   :  { %986 = vmatpush.bf16.msrb.mxu1 %v2080_v42 }
 0x799   :  { %v763_v43 = vpop.xlane.xlu2 %762 }
 0x79a   :  { %v767_v44 = vmul.f32 %v763_v43, %v2780_v12 }
 0x79c   :  { %v769_v51 = vsub.f32 %v757_v35, %v767_v44 }
 0x79e   :  { %v771_v45 = vmul.f32 %v769_v51, %v769_v51 }
 0x7a0   :  { %v773_v61 = vsel %vm268_vm0, %v771_v45, 0.0 }
 0x7a1   :  { %774 = vadd.xlane.f32.xlu1 %v773_v61  ;;  %v766_v46 = vpop.xlane.xlu0 %765 }
 0x7a2   :  { %v768_v47 = vmul.f32 %v766_v46, %v2780_v12 }
 0x7a4   :  { %v770_v48 = vsub.f32 %v758_v56, %v768_v47 }
 0x7a6   :  { %v772_v49 = vmul.f32 %v770_v48, %v770_v48 }
 0x7a8   :  { %v776_v50 = vsel %vm268_vm0, %v772_v49, 0.0 }
 0x7a9   :  { %777 = vadd.xlane.f32.xlu2 %v776_v50 }
 0x814   :  { %v775_v53 = vpop.xlane.xlu1 %774 }
 0x815   :  { %v779_v54 = vmul.f32 %v775_v53, %v2780_v12 }
 0x817   :  { %v781_v57 = vadd.f32 1e-12, %v779_v54 }
 0x819   :  { %2184 = vrsqrt.f32 %v781_v57  ;;  %vm789_vm12 = vweird.f32 %v781_v57 }
 0x81c   :  { %v778_v58 = vpop.xlane.xlu2 %777 }
 0x81d   :  { %v780_v60 = vmul.f32 %v778_v58, %v2780_v12  ;;  %v2078_v58 = vld [vmem:[%s3164_s13 + $0x8] sm:$0xff] }
 0x81f   :  { %v2185_v62 = vpop.eup %2184  ;;  %v782_v0 = vadd.f32 1e-12, %v780_v60 }
 0x820   :  { %v784_v59 = vmul.f32 %v2185_v62, %v781_v57  ;;  %vm790_vm11 = vweird.f32 %v2185_v62 }
 0x821   :  { %2186 = vrsqrt.f32 %v782_v0  ;;  %vm791_vm13 = vmor %vm789_vm12, %vm790_vm11  ;;  %vm799_vm15 = vweird.f32 %v782_v0 }
 0x822   :  { %v785_v1 = vmul.f32 %v2185_v62, %v784_v59 }
 0x824   :  { %v786_v2 = vmul.f32 0.5, %v785_v1 }
 0x826   :  { %v787_v3 = vsub.f32 1.5, %v786_v2  ;;  %v2077_v2 = vld [vmem:[%s3164_s13] sm:$0xff] }
 0x827   :  { %v2187_v5 = vpop.eup %2186 }
 0x828   :  { %v788_v6 = vmul.f32 %v2185_v62, %v787_v3  ;;  %v794_v7 = vmul.f32 %v2187_v5, %v782_v0  ;;  %vm800_vm14 = vweird.f32 %v2187_v5 }
 0x829   :  { %vm801_vm1 = vmor %vm799_vm15, %vm800_vm14 }
 0x82a   :  { %v795_v8 = vmul.f32 %v2187_v5, %v794_v7  ;;  %v792_v9 = vsel %vm791_vm13, %v2185_v62, %v788_v6  ;;  %vm978_vm13 = vcmask 523264  }
 0x82b   :  { %v803_v14 = vmul.f32 %v792_v9, %v769_v51 }
 0x82c   :  { %v796_v10 = vmul.f32 0.5, %v795_v8 }
 0x82d   :  { %v808_v18 = vmul.f32 %v2127_v13, %v803_v14 }
 0x82e   :  { %v797_v11 = vsub.f32 1.5, %v796_v10 }
 0x82f   :  { %v2906_v21 = vadd.f32 %v2128_v17, %v808_v18 }
 0x830   :  { %v798_v15 = vmul.f32 %v2187_v5, %v797_v11 }
 0x832   :  { %v802_v16 = vsel %vm801_vm1, %v2187_v5, %v798_v15 }
 0x833   :  { %v804_v19 = vmul.f32 %v802_v16, %v770_v48  ;;  %v2079_v48 = vld [vmem:[%s3164_s13 + $0x10] sm:$0xff] }
 0x834   :  { %987 = vmatpush.bf16.msrb.mxu1 %v2079_v48 }
 0x835   :  { %v809_v20 = vmul.f32 %v2127_v13, %v804_v19 }
 0x837   :  { %v2908_v22 = vadd.f32 %v2128_v17, %v809_v20 }
 0x838   :  { %988 = vmatpush.bf16.msrb.mxu1 %v2078_v58 }
 0x839   :  { %v819_v23 = vpack.c.bf16 %v2908_v22, %v2906_v21 }
 0x83b   :  { %1977 = vmatmul.msk.bf16.vlgmr.msrb.gmra.mxu0 %vm268_vm0, %v819_v23 }
 0x83c   :  { %989 = vmatpush.bf16.msrb.mxu1 %v2077_v2 }
 0x8b8   :  { %v848_v25 = vpop.f32.mrf.mxu0 }
 0x8b9   :  { %v2913_v26 = vadd.f32 %v2129_v24, %v848_v25 }
 0x8bb   :  { %v2916_v27 = vmul.f32 0.70710677, %v2913_v26 }
 0x8bd   :  { %v857_v28 = vmul.f32 %v2916_v27, %v2916_v27 }
 0x8bf   :  { %v858_v29 = vmin.f32 %v857_v28, 16.0 }
 0x8c0   :  { %v850_v30 = vpop.f32.mrf.mxu0 }
 0x8c1   :  { %v859_v31 = vmul.f32 2.1237322e-06, %v858_v29  ;;  %v870_v32 = vmul.f32 3.8918573e-05, %v858_v29  ;;  %v2920_v33 = vadd.f32 %v2129_v24, %v850_v30 }
 0x8c3   :  { %v860_v34 = vadd.f32 0.00028619796, %v859_v31  ;;  %v871_v35 = vadd.f32 0.001143296, %v870_v32  ;;  %v2923_v36 = vmul.f32 0.70710677, %v2920_v33 }
 0x8c4   :  { %v854_v48 = vmul.f32 0.5, %v2920_v33 }
 0x8c5   :  { %v872_v37 = vmul.f32 %v871_v35, %v858_v29  ;;  %v897_v38 = vmul.f32 %v2923_v36, %v2923_v36  ;;  %v861_v39 = vmul.f32 %v860_v34, %v858_v29 }
 0x8c7   :  { %v873_v40 = vadd.f32 0.014752088, %v872_v37  ;;  %v898_v41 = vmin.f32 %v897_v38, 16.0  ;;  %v862_v51 = vadd.f32 0.0036580483, %v861_v39 }
 0x8c9   :  { %v874_v56 = vmul.f32 %v873_v40, %v858_v29  ;;  %v899_v43 = vmul.f32 2.1237322e-06, %v898_v41  ;;  %v910_v44 = vmul.f32 3.8918573e-05, %v898_v41  ;;  %v863_v52 = vmul.f32 %v862_v51, %v858_v29 }
 0x8cb   :  { %v875_v45 = vadd.f32 0.112945676, %v874_v56  ;;  %v900_v61 = vadd.f32 0.00028619796, %v899_v43  ;;  %v911_v46 = vadd.f32 0.001143296, %v910_v44 }
 0x8cc   :  { %v864_v62 = vadd.f32 0.05243302, %v863_v52 }
 0x8cd   :  { %v876_v47 = vmul.f32 %v875_v45, %v858_v29  ;;  %v901_v49 = vmul.f32 %v900_v61, %v898_v41  ;;  %v912_v50 = vmul.f32 %v911_v46, %v898_v41 }
 0x8ce   :  { %v865_v5 = vmul.f32 %v864_v62, %v858_v29 }
 0x8cf   :  { %v877_v53 = vadd.f32 0.4994258, %v876_v47  ;;  %v902_v54 = vadd.f32 0.0036580483, %v901_v49  ;;  %v913_v55 = vadd.f32 0.014752088, %v912_v50 }
 0x8d0   :  { %v866_v10 = vadd.f32 0.18741608, %v865_v5  ;;  %v853_v47 = vmul.f32 0.5, %v2913_v26 }
 0x8d1   :  { %v878_v57 = vmul.f32 %v877_v53, %v858_v29  ;;  %v914_v60 = vmul.f32 %v913_v55, %v898_v41  ;;  %v903_v59 = vmul.f32 %v902_v54, %v898_v41 }
 0x8d2   :  { %v867_v16 = vmul.f32 %v866_v10, %v858_v29 }
 0x8d3   :  { %v879_v0 = vadd.f32 1.0, %v878_v57  ;;  %v915_v1 = vadd.f32 0.112945676, %v914_v60  ;;  %v904_v6 = vadd.f32 0.05243302, %v903_v59 }
 0x8d4   :  { %v868_v24 = vadd.f32 1.1283791, %v867_v16 }
 0x8d5   :  { %2188 = vrcp.f32 %v879_v0  ;;  %v916_v3 = vmul.f32 %v915_v1, %v898_v41  ;;  %v905_v13 = vmul.f32 %v904_v6, %v898_v41  ;;  %v891_v18 = vand.u32 2147483648, %v879_v0 }
 0x8d6   :  { %v889_v20 = vand.u32 2147483647, %v879_v0  ;;  %vm885_vm3 = vweird.f32 %v879_v0  ;;  %v869_v35 = vmul.f32 %v868_v24, %v2916_v27 }
 0x8d7   :  { %v917_v7 = vadd.f32 0.4994258, %v916_v3  ;;  %v906_v19 = vadd.f32 0.18741608, %v905_v13  ;;  %v892_v30 = vor.u32 1.1754944e-38, %v891_v18  ;;  %v2081_v13 = vld [vmem:[%s3191_s7 + $0x10] sm:$0xff] }
 0x8d8   :  { %vm890_vm5 = vcmp.eq.f32.partialorder %v889_v20, 8.507059e+37 }
 0x8d9   :  { %v918_v8 = vmul.f32 %v917_v7, %v898_v41  ;;  %v907_v31 = vmul.f32 %v906_v19, %v898_v41 }
 0x8db   :  { %v2189_v9 = vpop.eup %2188  ;;  %v919_v14 = vadd.f32 1.0, %v918_v8  ;;  %v908_v29 = vadd.f32 1.1283791, %v907_v31 }
 0x8dc   :  { %v881_v11 = vmul.f32 %v2189_v9, %v879_v0  ;;  %vm886_vm2 = vweird.f32 %v2189_v9 }
 0x8dd   :  { %2190 = vrcp.f32 %v919_v14  ;;  %vm887_vm4 = vmor %vm885_vm3, %vm886_vm2  ;;  %v931_v38 = vand.u32 2147483648, %v919_v14  ;;  %v929_v56 = vand.u32 2147483647, %v919_v14  ;;  %vm925_vm7 = vweird.f32 %v919_v14 }
 0x8de   :  { %v882_v15 = vsub.f32 1.0, %v881_v11  ;;  %v909_v51 = vmul.f32 %v908_v29, %v2923_v36  ;;  %v2130_v36 = vld [vmem:[%s3165_s14] ss:$0 sm:$0xff] }
 0x8df   :  { %v932_v43 = vor.u32 1.1754944e-38, %v931_v38  ;;  %vm930_vm12 = vcmp.eq.f32.partialorder %v929_v56, 8.507059e+37 }
 0x8e0   :  { %v883_v17 = vmul.f32 %v2189_v9, %v882_v15 }
 0x8e2   :  { %v884_v23 = vadd.f32 %v2189_v9, %v883_v17 }
 0x8e3   :  { %v2191_v25 = vpop.eup %2190 }
 0x8e4   :  { %v888_v28 = vsel %vm887_vm4, %v2189_v9, %v884_v23  ;;  %v921_v32 = vmul.f32 %v2191_v25, %v919_v14  ;;  %vm926_vm6 = vweird.f32 %v2191_v25 }
 0x8e5   :  { %v893_v34 = vsel %vm890_vm5, %v892_v30, %v888_v28  ;;  %vm927_vm11 = vmor %vm925_vm7, %vm926_vm6 }
 0x8e6   :  { %v922_v37 = vsub.f32 1.0, %v921_v32  ;;  %v894_v39 = vmul.f32 %v893_v34, %v869_v35  ;;  %v2131_v35 = vld [vmem:[#allocation20] ss:$0 sm:$0xff] }
 0x8e8   :  { %v923_v40 = vmul.f32 %v2191_v25, %v922_v37  ;;  %v1978_v44 = vclamps-f32 %v894_v39, 1.0  ;;  %v2132_v39 = vld [vmem:[%s3167_s16] ss:$0 sm:$0xff] }
 0x8ea   :  { %v924_v42 = vadd.f32 %v2191_v25, %v923_v40  ;;  %v937_v46 = vadd.f32 1.0, %v1978_v44 }
 0x8ec   :  { %v928_v41 = vsel %vm927_vm11, %v2191_v25, %v924_v42  ;;  %v939_v50 = vmul.f32 %v937_v46, %v853_v47 }
 0x8ed   :  { %v933_v45 = vsel %vm930_vm12, %v932_v43, %v928_v41 }
 0x8ee   :  { %v934_v61 = vmul.f32 %v933_v45, %v909_v51  ;;  %v2133_v45 = vld [vmem:[#allocation11 + $0x1] ss:$0 sm:$0xff] }
 0x8f0   :  { %v1979_v27 = vclamps-f32 %v934_v61, 1.0 }
 0x8f2   :  { %v938_v49 = vadd.f32 1.0, %v1979_v27 }
 0x8f4   :  { %v940_v52 = vmul.f32 %v938_v49, %v854_v48 }
 0x8f6   :  { %v949_v53 = vpack.c.bf16 %v940_v52, %v939_v50 }
 0x8f8   :  { %1996 = vmatmul.msk.bf16.vlgmr.msrb.gmra.mxu1 %vm978_vm13, %v949_v53 }
 0x975   :  { %v991_v54 = vpop.f32.mrf.mxu1 }
 0x976   :  { %v992_v55 = vadd.f32 %v2130_v36, %v991_v54 }
 0x978   :  { %v996_v57 = vadd.f32 %v992_v55, %v2906_v21 }
 0x97a   :  { %v1000_v58 = vsel %vm268_vm0, %v996_v57, 0.0 }
 0x97b   :  { %1001 = vadd.xlane.f32.xlu2 %v1000_v58 }
 0x97d   :  { %v993_v26 = vpop.f32.mrf.mxu1 }
 0x97e   :  { %v994_v33 = vadd.f32 %v2130_v36, %v993_v26 }
 0x980   :  { %v997_v60 = vadd.f32 %v994_v33, %v2908_v22  ;;  %v2082_v22 = vld [vmem:[%s3191_s7 + $0x18] sm:$0xff] }
 0x981   :  { %1086 = vmatpush.bf16.msrb.mxu3 %v2082_v22 }
 0x982   :  { %v1003_v62 = vsel %vm268_vm0, %v997_v60, 0.0 }
 0x983   :  { %1004 = vadd.xlane.f32.xlu2 %v1003_v62 }
 0x985   :  { %1087 = vmatpush.bf16.msrb.mxu3 %v2081_v13 }
 0x9ee   :  { %v1002_v0 = vpop.xlane.xlu2 %1001 }
 0x9ef   :  { %v1006_v59 = vmul.f32 %v1002_v0, %v2780_v12 }
 0x9f1   :  { %v1008_v1 = vsub.f32 %v996_v57, %v1006_v59 }
 0x9f3   :  { %v1010_v2 = vmul.f32 %v1008_v1, %v1008_v1 }
 0x9f5   :  { %v1012_v3 = vsel %vm268_vm0, %v1010_v2, 0.0 }
 0x9f6   :  { %1013 = vadd.xlane.f32.xlu0 %v1012_v3  ;;  %v1005_v5 = vpop.xlane.xlu2 %1004 }
 0x9f7   :  { %v1007_v21 = vmul.f32 %v1005_v5, %v2780_v12 }
 0x9f9   :  { %v1009_v6 = vsub.f32 %v997_v60, %v1007_v21 }
 0x9fb   :  { %v1011_v7 = vmul.f32 %v1009_v6, %v1009_v6 }
 0x9fd   :  { %v1015_v8 = vsel %vm268_vm0, %v1011_v7, 0.0  ;;  %v2010_v7 = vld [vmem:[%s3192_s0 + $0x20] sm:$0xff] }
 0x9fe   :  { %1016 = vadd.xlane.f32.xlu1 %v1015_v8  ;;  %v1171_v8 = vpack.c.bf16 %v2010_v7, %v2010_v7 }
 0xa69   :  { %v1014_v9 = vpop.xlane.xlu0 %1013 }
 0xa6a   :  { %v1018_v10 = vmul.f32 %v1014_v9, %v2780_v12 }
 0xa6c   :  { %v1020_v11 = vadd.f32 1e-12, %v1018_v10 }
 0xa6e   :  { %2192 = vrsqrt.f32 %v1020_v11  ;;  %vm1028_vm15 = vweird.f32 %v1020_v11 }
 0xa71   :  { %v1017_v14 = vpop.xlane.xlu1 %1016 }
 0xa72   :  { %v1019_v15 = vmul.f32 %v1017_v14, %v2780_v12 }
 0xa74   :  { %v2193_v16 = vpop.eup %2192  ;;  %v1021_v17 = vadd.f32 1e-12, %v1019_v15 }
 0xa75   :  { %v1023_v18 = vmul.f32 %v2193_v16, %v1020_v11  ;;  %vm1029_vm14 = vweird.f32 %v2193_v16  ;;  %v1269_v11 = vsel %vm523_vm10, %v1171_v8, 0 }
 0xa76   :  { %2194 = vrsqrt.f32 %v1021_v17  ;;  %vm1030_vm1 = vmor %vm1028_vm15, %vm1029_vm14  ;;  %vm1038_vm3 = vweird.f32 %v1021_v17 }
 0xa77   :  { %v1024_v19 = vmul.f32 %v2193_v16, %v1023_v18 }
 0xa79   :  { %v1025_v20 = vmul.f32 0.5, %v1024_v19 }
 0xa7b   :  { %v1026_v23 = vsub.f32 1.5, %v1025_v20 }
 0xa7c   :  { %v2195_v24 = vpop.eup %2194 }
 0xa7d   :  { %v1027_v25 = vmul.f32 %v2193_v16, %v1026_v23  ;;  %v1033_v28 = vmul.f32 %v2195_v24, %v1021_v17  ;;  %vm1039_vm2 = vweird.f32 %v2195_v24 }
 0xa7e   :  { %vm1040_vm4 = vmor %vm1038_vm3, %vm1039_vm2 }
 0xa7f   :  { %v1034_v30 = vmul.f32 %v2195_v24, %v1033_v28  ;;  %v1031_v31 = vsel %vm1030_vm1, %v2193_v16, %v1027_v25 }
 0xa80   :  { %v1042_v37 = vmul.f32 %v1031_v31, %v1008_v1 }
 0xa81   :  { %v1035_v32 = vmul.f32 0.5, %v1034_v30 }
 0xa82   :  { %v1047_v40 = vmul.f32 %v2131_v35, %v1042_v37 }
 0xa83   :  { %v1036_v34 = vsub.f32 1.5, %v1035_v32  ;;  %v2254_v32 = vld [vmem:[#allocation6] sm:$0xff] }
 0xa84   :  { %v2966_v43 = vadd.f32 %v2132_v39, %v1047_v40 }
 0xa85   :  { %v1037_v29 = vmul.f32 %v2195_v24, %v1036_v34 }
 0xa87   :  { %v1041_v38 = vsel %vm1040_vm4, %v2195_v24, %v1037_v29 }
 0xa88   :  { %v1043_v56 = vmul.f32 %v1041_v38, %v1009_v6 }
 0xa8a   :  { %v1048_v42 = vmul.f32 %v2131_v35, %v1043_v56 }
 0xa8c   :  { %v2968_v44 = vadd.f32 %v2132_v39, %v1048_v42  ;;  %v2255_v39 = vld [vmem:[#allocation6 + $0x8] sm:$0xff] }
 0xa8e   :  { %v1059_v51 = vpack.c.bf16 %v2968_v44, %v2966_v43 }
 0xa90   :  { %2009 = vmatmul.msk.bf16.vlgmr.msrb.gmra.mxu3 %vm268_vm0, %v1059_v51 }
 0xb13   :  { %v1089_v41 = vpop.f32.mrf.mxu3 }
 0xb14   :  { %v1090_v46 = vadd.f32 %v2133_v45, %v1089_v41 }
 0xb1b   :  { %v1091_v61 = vpop.f32.mrf.mxu3 }
 0xb1c   :  { %v1092_v27 = vadd.f32 %v2133_v45, %v1091_v61 }
 0xb1e   :  { %v2973_v47 = vpack.c.bf16 %v1092_v27, %v1090_v46 }
 0xb20   :  { %1101 = vrot.lane.b32.xlu2 %v2973_v47, %s2577_s29 }
 0xb28   :  { %1172 = vrot.lane.b32.xlu2 %v2973_v47, %s2580_s12 }
 0xb30   :  { %1287 = vrot.lane.b32.xlu2 %v2973_v47, %s2578_s3 }
 0xb38   :  { %1382 = vrot.lane.b32.xlu2 %v2973_v47, %s2581_s6 }
 0xb7a   :  { %v1102_v48 = vpop.permute.xlu2 %1101 }
 0xb7b   :  { %v1107_v49 = vsel %vm376_vm8, %v1102_v48, 0 }
 0xb7c   :  { %1116 = vmatpush.bf16.xpose.msra.mxu2 %v1107_v49 }
 0xb83   :  { %2014 = vmatmul.msk.bf16.vlgmr.msra.gmra.mxu2 %vm376_vm8, %v2973_v47 }
 0xc06   :  { %v1118_v50 = vpop.f32.mrf.mxu2 }
 0xc07   :  { %v1123_v52 = vmul.f32 0.35355338, %v1118_v50 }
 0xc09   :  { %v1125_v53 = vadd.f32 %v1123_v52, %v2808_v63 }
 0xc0b   :  { %v1127_v36 = vsel %vm401_vm9, %v1125_v53, -inf }
 0xc0c   :  { %1128 = vmax.xlane.f32.xlu0 %v1127_v36 }
 0xc0e   :  { %v1120_v54 = vpop.f32.mrf.mxu2 }
 0xc0f   :  { %v1124_v55 = vmul.f32 0.35355338, %v1120_v54 }
 0xc11   :  { %v1126_v57 = vadd.f32 %v1124_v55, %v2812_v4  ;;  %v1173_v4 = vpop.permute.xlu2 %1172 }
 0xc13   :  { %v1130_v58 = vsel %vm401_vm9, %v1126_v57, -inf }
 0xc14   :  { %1131 = vmax.xlane.f32.xlu1 %v1130_v58 }
 0xc19   :  { %v1288_v6 = vpop.permute.xlu2 %1287 }
 0xc1a   :  { %v1293_v20 = vsel %vm376_vm8, %v1288_v6, 0 }
 0xc21   :  { %v1383_v15 = vpop.permute.xlu2 %1382 }
 0xc22   :  { %v1388_v17 = vsel %vm376_vm8, %v1383_v15, 0 }
 0xc7f   :  { %v1129_v26 = vpop.xlane.xlu0 %1128 }
 0xc80   :  { %v1133_v33 = vsub.f32 %v1125_v53, %v1129_v26 }
 0xc82   :  { %v1135_v60 = vmul.f32 1.442695, %v1133_v33 }
 0xc84   :  { %2196 = vpow2.f32 %v1135_v60 }
 0xc87   :  { %v1132_v62 = vpop.xlane.xlu1 %1131 }
 0xc88   :  { %v1134_v0 = vsub.f32 %v1126_v57, %v1132_v62 }
 0xc8a   :  { %v2197_v59 = vpop.eup %2196  ;;  %v1137_v1 = vmul.f32 1.442695, %v1134_v0 }
 0xc8b   :  { %v1139_v63 = vsel %vm401_vm9, %v2197_v59, 0.0 }
 0xc8c   :  { %2198 = vpow2.f32 %v1137_v1  ;;  %1140 = vadd.xlane.f32.xlu0 %v1139_v63 }
 0xc92   :  { %v2199_v2 = vpop.eup %2198 }
 0xc93   :  { %v1142_v3 = vsel %vm401_vm9, %v2199_v2, 0.0 }
 0xc94   :  { %1143 = vadd.xlane.f32.xlu1 %v1142_v3 }
 0xca0   :  { %1150 = vrot.lane.b32.xlu0 %v2973_v47, %s2572_s28 }
 0xca8   :  { %1285 = vrot.lane.b32.xlu0 %v2973_v47, %s2582_s2 }
 0xcad   :  { %1174 = vrot.lane.b32.xlu1 %v2973_v47, %s2579_s24 }
 0xcb5   :  { %1380 = vrot.lane.b32.xlu1 %v2973_v47, %s2583_s9 }
 0xcff   :  { %v1141_v5 = vpop.xlane.xlu0 %1140 }
 0xd07   :  { %v1144_v21 = vpop.xlane.xlu1 %1143 }
 0xd08   :  { %2200 = vrcp.f32 %v1144_v21 }
 0xd09   :  { %2202 = vrcp.f32 %v1141_v5 }
 0xd0e   :  { %v2201_v22 = vpop.eup %2200 }
 0xd0f   :  { %v2203_v9 = vpop.eup %2202  ;;  %v1148_v10 = vmul.f32 %v2201_v22, %v2199_v2 }
 0xd10   :  { %v1147_v13 = vmul.f32 %v2203_v9, %v2197_v59 }
 0xd12   :  { %v1151_v14 = vpop.permute.xlu0 %1150  ;;  %v1149_v16 = vpack.c.bf16 %v1148_v10, %v1147_v13 }
 0xd13   :  { %1163 = vmatpush.bf16.msra.mxu0 %v1151_v14 }
 0xd16   :  { %2015 = vmatmul.msk.bf16.vlgmr.msra.gmra.mxu0 %vm401_vm9, %v1149_v16 }
 0xd17   :  { %1278 = vmatpush.bf16.msrb.mxu0 %v1269_v11 }
 0xd1a   :  { %v1286_v23 = vpop.permute.xlu0 %1285 }
 0xd1b   :  { %1397 = vmatpush.bf16.xpose.msra.mxu0 %v1388_v17 }
 0xd1f   :  { %v1175_v18 = vpop.permute.xlu1 %1174 }
 0xd20   :  { %v1180_v19 = vsel %vm376_vm8, %v1175_v18, 0 }
 0xd21   :  { %1189 = vmatpush.bf16.xpose.msra.mxu1 %v1180_v19 }
 0xd27   :  { %v1381_v37 = vpop.permute.xlu1 %1380 }
 0xd28   :  { %2016 = vmatmul.msk.bf16.vlgmr.msra.gmra.mxu1 %vm376_vm8, %v1173_v4 }
 0xd29   :  { %1302 = vmatpush.bf16.xpose.msrb.mxu1 %v1293_v20 }
 0xd38   :  { %2020 = vmatmul.msk.bf16.vlgmr.msrb.gmra.mxu1 %vm376_vm8, %v1286_v23 }
 0xd93   :  { %v1165_v24 = vpop.f32.mrf.mxu0 }
 0xd9b   :  { %v1167_v25 = vpop.f32.mrf.mxu0 }
 0xd9c   :  { %v1170_v28 = vpack.c.bf16 %v1167_v25, %v1165_v24 }
 0xd9e   :  { %2019 = vmatmul.msk.bf16.vlgmr.msrb.gmra.mxu0 %vm376_vm8, %v1170_v28 }
 0xda5   :  { %v1191_v30 = vpop.f32.mrf.mxu1 }
 0xda6   :  { %v1196_v31 = vmul.f32 0.35355338, %v1191_v30 }
 0xda8   :  { %v1198_v34 = vadd.f32 %v2254_v32, %v1196_v31 }
 0xdaa   :  { %v1200_v35 = vsel %vm401_vm9, %v1198_v34, -inf }
 0xdab   :  { %1201 = vmax.xlane.f32.xlu0 %v1200_v35 }
 0xdad   :  { %v1193_v29 = vpop.f32.mrf.mxu1 }
 0xdae   :  { %v1197_v38 = vmul.f32 0.35355338, %v1193_v29  ;;  %2023 = vmatmul.msk.bf16.vlgmr.msra.gmra.mxu0 %vm376_vm8, %v1381_v37 }
 0xdb0   :  { %v1199_v40 = vadd.f32 %v2255_v39, %v1197_v38 }
 0xdb2   :  { %v1203_v56 = vsel %vm401_vm9, %v1199_v40, -inf }
 0xdb3   :  { %1204 = vmax.xlane.f32.xlu2 %v1203_v56 }
 0xdb5   :  { %v1304_v42 = vpop.f32.mrf.mxu1 }
 0xdb6   :  { %v1309_v51 = vmul.f32 0.35355338, %v1304_v42  ;;  %v2011_v42 = vld [vmem:[%s3192_s0 + $0x28] sm:$0xff] }
 0xdb8   :  { %v1311_v41 = vadd.f32 %v2254_v32, %v1309_v51 }
 0xdba   :  { %v1313_v45 = vsel %vm401_vm9, %v1311_v41, -inf }
 0xdbb   :  { %1314 = vmax.xlane.f32.xlu1 %v1313_v45 }
 0xdbd   :  { %v1306_v61 = vpop.f32.mrf.mxu1 }
 0xdbe   :  { %v1310_v46 = vmul.f32 0.35355338, %v1306_v61 }
 0xdc0   :  { %v1312_v27 = vadd.f32 %v2255_v39, %v1310_v46 }
 0xdc2   :  { %v1316_v48 = vsel %vm401_vm9, %v1312_v27, -inf }
 0xdc3   :  { %1317 = vmax.xlane.f32.xlu0 %v1316_v48 }
 0xe1b   :  { %v3016_v49 = vpop.f32.mrf.mxu0 }
 0xe1e   :  { %v1202_v50 = vpop.xlane.xlu0 %1201 }
 0xe1f   :  { %v1206_v52 = vsub.f32 %v1198_v34, %v1202_v50 }
 0xe21   :  { %v1208_v53 = vmul.f32 1.442695, %v1206_v52 }
 0xe23   :  { %2204 = vpow2.f32 %v1208_v53  ;;  %v3018_v36 = vpop.f32.mrf.mxu0 }
 0xe26   :  { %v1205_v54 = vpop.xlane.xlu2 %1204 }
 0xe27   :  { %v1207_v55 = vsub.f32 %v1199_v40, %v1205_v54 }
 0xe29   :  { %v2205_v57 = vpop.eup %2204  ;;  %v1210_v26 = vmul.f32 1.442695, %v1207_v55 }
 0xe2a   :  { %v1212_v58 = vsel %vm401_vm9, %v2205_v57, 0.0 }
 0xe2b   :  { %1213 = vadd.xlane.f32.xlu0 %v1212_v58  ;;  %v1399_v33 = vpop.f32.mrf.mxu0  ;;  %2206 = vpow2.f32 %v1210_v26 }
 0xe2c   :  { %v1404_v60 = vmul.f32 0.35355338, %v1399_v33 }
 0xe2e   :  { %v1315_v62 = vpop.xlane.xlu1 %1314  ;;  %v1406_v0 = vadd.f32 %v2254_v32, %v1404_v60  ;;  %v2013_v60 = vld [vmem:[%s3192_s0 + $0x38] sm:$0xff] }
 0xe2f   :  { %v1319_v59 = vsub.f32 %v1311_v41, %v1315_v62  ;;  %v1244_v41 = vpack.c.bf16 %v2011_v42, %v2011_v42  ;;  %v1452_v62 = vpack.c.bf16 %v2013_v60, %v2013_v60  ;;  %v2083_v42 = vld [vmem:[#allocation17 + $0x10] sm:$0xff] }
 0xe30   :  { %v1408_v1 = vsel %vm401_vm9, %v1406_v0, -inf }
 0xe31   :  { %v1321_v63 = vmul.f32 1.442695, %v1319_v59  ;;  %1409 = vmax.xlane.f32.xlu2 %v1408_v1  ;;  %v2207_v4 = vpop.eup %2206  ;;  %v1249_v46 = vsel %vm523_vm10, %v1244_v41, 0  ;;  %v2012_v59 = vld [vmem:[%s3192_s0 + $0x30] sm:$0xff] }
 0xe32   :  { %v1215_v8 = vsel %vm401_vm9, %v2207_v4, 0.0  ;;  %1258 = vmatpush.bf16.msrb.mxu2 %v1249_v46  ;;  %v1357_v1 = vpack.c.bf16 %v2012_v59, %v2012_v59 }
 0xe33   :  { %2208 = vpow2.f32 %v1321_v63  ;;  %v1401_v2 = vpop.f32.mrf.mxu0 }
 0xe34   :  { %v1405_v3 = vmul.f32 0.35355338, %v1401_v2  ;;  %v1362_v63 = vsel %vm523_vm10, %v1357_v1, 0 }
 0xe36   :  { %v1318_v5 = vpop.xlane.xlu0 %1317  ;;  %v1407_v21 = vadd.f32 %v2255_v39, %v1405_v3  ;;  %1371 = vmatpush.bf16.msra.mxu2 %v1362_v63 }
 0xe37   :  { %v1320_v6 = vsub.f32 %v1312_v27, %v1318_v5 }
 0xe38   :  { %v1411_v7 = vsel %vm401_vm9, %v1407_v21, -inf }
 0xe39   :  { %v2209_v22 = vpop.eup %2208  ;;  %v1323_v9 = vmul.f32 1.442695, %v1320_v6  ;;  %1412 = vmax.xlane.f32.xlu1 %v1411_v7  ;;  %1216 = vadd.xlane.f32.xlu2 %v1215_v8 }
 0xe3a   :  { %v1325_v10 = vsel %vm401_vm9, %v2209_v22, 0.0 }
 0xe3b   :  { %2210 = vpow2.f32 %v1323_v9  ;;  %1326 = vadd.xlane.f32.xlu0 %v1325_v10 }
 0xe41   :  { %v2211_v11 = vpop.eup %2210 }
 0xe42   :  { %v1328_v13 = vsel %vm401_vm9, %v2211_v11, 0.0 }
 0xe43   :  { %1329 = vadd.xlane.f32.xlu2 %v1328_v13 }
 0xe52   :  { %1223 = vrot.lane.b32.xlu1 %v2973_v47, %s2584_s11 }
 0xe9e   :  { %v1214_v28 = vpop.xlane.xlu0 %1213 }
 0xea4   :  { %v1410_v14 = vpop.xlane.xlu2 %1409 }
 0xea5   :  { %v1414_v15 = vsub.f32 %v1406_v0, %v1410_v14  ;;  %v1457_v0 = vsel %vm523_vm10, %v1452_v62, 0  ;;  %v2134_v14 = vld [vmem:[#allocation12 + $0x1] ss:$0 sm:$0xff] }
 0xea7   :  { %v1416_v16 = vmul.f32 1.442695, %v1414_v15 }
 0xea9   :  { %2212 = vpow2.f32 %v1416_v16 }
 0xeac   :  { %v1413_v17 = vpop.xlane.xlu1 %1412  ;;  %v1217_v24 = vpop.xlane.xlu2 %1216 }
 0xead   :  { %v1415_v18 = vsub.f32 %v1407_v21, %v1413_v17 }
 0xeae   :  { %v1327_v38 = vpop.xlane.xlu0 %1326 }
 0xeaf   :  { %v2213_v19 = vpop.eup %2212  ;;  %v1418_v20 = vmul.f32 1.442695, %v1415_v18 }
 0xeb0   :  { %v1420_v23 = vsel %vm401_vm9, %v2213_v19, 0.0 }
 0xeb1   :  { %2214 = vpow2.f32 %v1418_v20  ;;  %1421 = vadd.xlane.f32.xlu0 %v1420_v23 }
 0xeb2   :  { %2216 = vrcp.f32 %v1217_v24 }
 0xeb3   :  { %2218 = vrcp.f32 %v1214_v28 }
 0xeb6   :  { %v1330_v39 = vpop.xlane.xlu2 %1329 }
 0xeb7   :  { %v2215_v25 = vpop.eup %2214 }
 0xeb8   :  { %v1423_v30 = vsel %vm401_vm9, %v2215_v25, 0.0  ;;  %v2217_v31 = vpop.eup %2216 }
 0xeb9   :  { %1424 = vadd.xlane.f32.xlu2 %v1423_v30  ;;  %v2219_v32 = vpop.eup %2218  ;;  %v1221_v34 = vmul.f32 %v2217_v31, %v2207_v4 }
 0xeba   :  { %v1220_v35 = vmul.f32 %v2219_v32, %v2205_v57 }
 0xebc   :  { %v1222_v29 = vpack.c.bf16 %v1221_v34, %v1220_v35 }
 0xec4   :  { %v1224_v37 = vpop.permute.xlu1 %1223 }
 0xec5   :  { %1236 = vmatpush.bf16.msra.mxu3 %v1224_v37  ;;  %1336 = vrot.lane.b32.xlu0 %v2973_v47, %s2586_s4 }
 0xec8   :  { %2017 = vmatmul.msk.bf16.vlgmr.msra.gmra.mxu3 %vm401_vm9, %v1222_v29 }
 0xed1   :  { %1431 = vrot.lane.b32.xlu2 %v2973_v47, %s2585_s10 }
 0xf24   :  { %v1422_v40 = vpop.xlane.xlu0 %1421 }
 0xf25   :  { %2220 = vrcp.f32 %v1422_v40 }
 0xf26   :  { %2222 = vrcp.f32 %v1330_v39 }
 0xf2b   :  { %v2221_v51 = vpop.eup %2220 }
 0xf2c   :  { %v1425_v56 = vpop.xlane.xlu2 %1424  ;;  %v2223_v45 = vpop.eup %2222  ;;  %v1428_v47 = vmul.f32 %v2221_v51, %v2213_v19 }
 0xf2d   :  { %2224 = vrcp.f32 %v1425_v56  ;;  %v1334_v52 = vmul.f32 %v2223_v45, %v2211_v11 }
 0xf2e   :  { %2226 = vrcp.f32 %v1327_v38 }
 0xf33   :  { %v2225_v61 = vpop.eup %2224 }
 0xf34   :  { %v2227_v27 = vpop.eup %2226  ;;  %v1429_v48 = vmul.f32 %v2225_v61, %v2215_v25  ;;  %v1432_v50 = vpop.permute.xlu2 %1431 }
 0xf35   :  { %1444 = vmatpush.bf16.msra.mxu1 %v1432_v50  ;;  %v1333_v54 = vmul.f32 %v2227_v27, %v2209_v22 }
 0xf36   :  { %v1430_v53 = vpack.c.bf16 %v1429_v48, %v1428_v47 }
 0xf37   :  { %v1337_v55 = vpop.permute.xlu0 %1336  ;;  %v1335_v57 = vpack.c.bf16 %v1334_v52, %v1333_v54 }
 0xf38   :  { %1349 = vmatpush.bf16.msrb.mxu3 %v1337_v55  ;;  %2024 = vmatmul.msk.bf16.vlgmr.msra.gmra.mxu1 %vm401_vm9, %v1430_v53 }
 0xf3b   :  { %2021 = vmatmul.msk.bf16.vlgmr.msrb.gmra.mxu3 %vm401_vm9, %v1335_v57 }
 0xf3c   :  { %1466 = vmatpush.bf16.msra.mxu3 %v1457_v0  ;;  %v2136_v0 = vld [vmem:[#allocation15 + $0x1] ss:$0 sm:$0xff] }
 0xf4b   :  { %v1238_v58 = vpop.f32.mrf.mxu3 }
 0xf53   :  { %v1240_v26 = vpop.f32.mrf.mxu3 }
 0xf54   :  { %v1243_v33 = vpack.c.bf16 %v1240_v26, %v1238_v58  ;;  %v2135_v26 = vld [vmem:[#allocation14 + $0x1] ss:$0 sm:$0xff] }
 0xf56   :  { %2018 = vmatmul.msk.bf16.vlgmr.msrb.gmra.mxu2 %vm376_vm8, %v1243_v33 }
 0xfb5   :  { %v1446_v2 = vpop.f32.mrf.mxu1 }
 0xfbd   :  { %v1448_v3 = vpop.f32.mrf.mxu1 }
 0xfbe   :  { %v1451_v4 = vpack.c.bf16 %v1448_v3, %v1446_v2  ;;  %v1351_v5 = vpop.f32.mrf.mxu3 }
 0xfc0   :  { %2025 = vmatmul.msk.bf16.vlgmr.msra.gmra.mxu3 %vm376_vm8, %v1451_v4 }
 0xfc6   :  { %v1353_v21 = vpop.f32.mrf.mxu3 }
 0xfc7   :  { %v1356_v6 = vpack.c.bf16 %v1353_v21, %v1351_v5  ;;  %v2137_v5 = vld [vmem:[#allocation18 + $0x1] ss:$0 sm:$0xff] }
 0xfc9   :  { %2022 = vmatmul.msk.bf16.vlgmr.msra.gmra.mxu2 %vm376_vm8, %v1356_v6 }
 0xfd9   :  { %v1260_v7 = vpop.f32.mrf.mxu2 }
 0xfda   :  { %v1281_v22 = vadd.f32 %v3016_v49, %v1260_v7 }
 0xfe1   :  { %v1262_v8 = vpop.f32.mrf.mxu2 }
 0xfe2   :  { %v1283_v16 = vadd.f32 %v3018_v36, %v1262_v8 }
0x1043   :  { %v1468_v9 = vpop.f32.mrf.mxu3 }
0x104b   :  { %v1470_v23 = vpop.f32.mrf.mxu3 }
0x104c   :  { %v1373_v10 = vpop.f32.mrf.mxu2 }
0x104d   :  { %v1378_v11 = vadd.f32 %v1373_v10, %v1281_v22 }
0x104f   :  { %v1473_v13 = vadd.f32 %v1468_v9, %v1378_v11 }
0x1051   :  { %v1475_v15 = vadd.f32 %v1473_v13, %v2966_v43 }
0x1053   :  { %v1482_v17 = vadd.f32 %v2134_v14, %v1475_v15 }
0x1054   :  { %v1375_v18 = vpop.f32.mrf.mxu2 }
0x1055   :  { %v1379_v19 = vadd.f32 %v1375_v18, %v1283_v16  ;;  %v1488_v20 = vsel %vm268_vm0, %v1482_v17, 0.0 }
0x1056   :  { %1489 = vadd.xlane.f32.xlu1 %v1488_v20 }
0x1057   :  { %v1474_v24 = vadd.f32 %v1470_v23, %v1379_v19 }
0x1059   :  { %v1476_v25 = vadd.f32 %v1474_v24, %v2968_v44  ;;  %v2084_v44 = vld [vmem:[#allocation17 + $0x18] sm:$0xff] }
0x105a   :  { %1574 = vmatpush.bf16.msrb.mxu2 %v2084_v44 }
0x105b   :  { %v1483_v49 = vadd.f32 %v2134_v14, %v1476_v25  ;;  %v2088_v25 = vld [vmem:[%s3164_s13 + $0x38] sm:$0xff] }
0x105c   :  { %1716 = vmatpush.bf16.msrb.mxu0 %v2088_v25 }
0x105d   :  { %v1491_v28 = vsel %vm268_vm0, %v1483_v49, 0.0 }
0x105e   :  { %1492 = vadd.xlane.f32.xlu0 %v1491_v28  ;;  %1575 = vmatpush.bf16.msrb.mxu2 %v2083_v42 }
0x10c9   :  { %v1490_v30 = vpop.xlane.xlu1 %1489 }
0x10ca   :  { %v1494_v31 = vmul.f32 %v1490_v30, %v2780_v12 }
0x10cc   :  { %v1496_v43 = vsub.f32 %v1482_v17, %v1494_v31 }
0x10ce   :  { %v1498_v32 = vmul.f32 %v1496_v43, %v1496_v43 }
0x10d0   :  { %v1500_v36 = vsel %vm268_vm0, %v1498_v32, 0.0 }
0x10d1   :  { %1501 = vadd.xlane.f32.xlu2 %v1500_v36  ;;  %v1493_v34 = vpop.xlane.xlu0 %1492 }
0x10d2   :  { %v1495_v35 = vmul.f32 %v1493_v34, %v2780_v12  ;;  %v2087_v34 = vld [vmem:[%s3164_s13 + $0x30] sm:$0xff] }
0x10d3   :  { %1717 = vmatpush.bf16.msrb.mxu0 %v2087_v34 }
0x10d4   :  { %v1497_v37 = vsub.f32 %v1483_v49, %v1495_v35 }
0x10d6   :  { %v1499_v29 = vmul.f32 %v1497_v37, %v1497_v37 }
0x10d8   :  { %v1503_v38 = vsel %vm268_vm0, %v1499_v29, 0.0 }
0x10d9   :  { %1504 = vadd.xlane.f32.xlu1 %v1503_v38 }
0x1144   :  { %v1502_v39 = vpop.xlane.xlu2 %1501 }
0x1145   :  { %v1506_v40 = vmul.f32 %v1502_v39, %v2780_v12 }
0x1147   :  { %v1508_v56 = vadd.f32 1e-12, %v1506_v40 }
0x1149   :  { %2228 = vrsqrt.f32 %v1508_v56  ;;  %vm1516_vm9 = vweird.f32 %v1508_v56 }
0x114c   :  { %v1505_v51 = vpop.xlane.xlu1 %1504 }
0x114d   :  { %v1507_v41 = vmul.f32 %v1505_v51, %v2780_v12 }
0x114f   :  { %v2229_v45 = vpop.eup %2228  ;;  %v1509_v61 = vadd.f32 1e-12, %v1507_v41 }
0x1150   :  { %v1511_v46 = vmul.f32 %v2229_v45, %v1508_v56  ;;  %vm1517_vm8 = vweird.f32 %v2229_v45  ;;  %v2086_v56 = vld [vmem:[%s3164_s13 + $0x28] sm:$0xff] }
0x1151   :  { %2230 = vrsqrt.f32 %v1509_v61  ;;  %vm1518_vm10 = vmor %vm1516_vm9, %vm1517_vm8  ;;  %vm1526_vm6 = vweird.f32 %v1509_v61  ;;  %1718 = vmatpush.bf16.msrb.mxu0 %v2086_v56 }
0x1152   :  { %v1512_v27 = vmul.f32 %v2229_v45, %v1511_v46  ;;  %v2085_v46 = vld [vmem:[%s3164_s13 + $0x20] sm:$0xff] }
0x1154   :  { %v1513_v47 = vmul.f32 0.5, %v1512_v27 }
0x1155   :  { %1719 = vmatpush.bf16.msrb.mxu0 %v2085_v46 }
0x1156   :  { %v1514_v48 = vsub.f32 1.5, %v1513_v47 }
0x1157   :  { %v2231_v50 = vpop.eup %2230 }
0x1158   :  { %v1515_v52 = vmul.f32 %v2229_v45, %v1514_v48  ;;  %v1521_v53 = vmul.f32 %v2231_v50, %v1509_v61  ;;  %vm1527_vm5 = vweird.f32 %v2231_v50 }
0x1159   :  { %vm1528_vm7 = vmor %vm1526_vm6, %vm1527_vm5 }
0x115a   :  { %v1522_v54 = vmul.f32 %v2231_v50, %v1521_v53  ;;  %v1519_v55 = vsel %vm1518_vm10, %v2229_v45, %v1515_v52 }
0x115b   :  { %v1530_v33 = vmul.f32 %v1519_v55, %v1496_v43 }
0x115c   :  { %v1523_v57 = vmul.f32 0.5, %v1522_v54 }
0x115d   :  { %v1535_v59 = vmul.f32 %v2135_v26, %v1530_v33 }
0x115e   :  { %v1524_v58 = vsub.f32 1.5, %v1523_v57 }
0x115f   :  { %v3064_v2 = vadd.f32 %v2136_v0, %v1535_v59 }
0x1160   :  { %v1525_v60 = vmul.f32 %v2231_v50, %v1524_v58 }
0x1162   :  { %v1529_v62 = vsel %vm1528_vm7, %v2231_v50, %v1525_v60 }
0x1163   :  { %v1531_v1 = vmul.f32 %v1529_v62, %v1497_v37 }
0x1165   :  { %v1536_v63 = vmul.f32 %v2135_v26, %v1531_v1 }
0x1167   :  { %v3066_v3 = vadd.f32 %v2136_v0, %v1536_v63 }
0x1169   :  { %v1547_v4 = vpack.c.bf16 %v3066_v3, %v3064_v2 }
0x116b   :  { %2034 = vmatmul.msk.bf16.vlgmr.msrb.gmra.mxu2 %vm268_vm0, %v1547_v4 }
0x11ee   :  { %v1577_v21 = vpop.f32.mrf.mxu2 }
0x11ef   :  { %v3071_v6 = vadd.f32 %v2137_v5, %v1577_v21 }
0x11f1   :  { %v3074_v7 = vmul.f32 0.70710677, %v3071_v6 }
0x11f3   :  { %v1586_v8 = vmul.f32 %v3074_v7, %v3074_v7 }
0x11f5   :  { %v1587_v22 = vmin.f32 %v1586_v8, 16.0 }
0x11f6   :  { %v1579_v9 = vpop.f32.mrf.mxu2 }
0x11f7   :  { %v1588_v10 = vmul.f32 2.1237322e-06, %v1587_v22  ;;  %v1599_v11 = vmul.f32 3.8918573e-05, %v1587_v22  ;;  %v3078_v13 = vadd.f32 %v2137_v5, %v1579_v9 }
0x11f9   :  { %v1589_v14 = vadd.f32 0.00028619796, %v1588_v10  ;;  %v1600_v15 = vadd.f32 0.001143296, %v1599_v11  ;;  %v3081_v16 = vmul.f32 0.70710677, %v3078_v13 }
0x11fb   :  { %v1601_v17 = vmul.f32 %v1600_v15, %v1587_v22  ;;  %v1626_v18 = vmul.f32 %v3081_v16, %v3081_v16  ;;  %v1590_v19 = vmul.f32 %v1589_v14, %v1587_v22 }
0x11fd   :  { %v1602_v20 = vadd.f32 0.014752088, %v1601_v17  ;;  %v1627_v23 = vmin.f32 %v1626_v18, 16.0  ;;  %v1591_v30 = vadd.f32 0.0036580483, %v1590_v19 }
0x11ff   :  { %v1603_v24 = vmul.f32 %v1602_v20, %v1587_v22  ;;  %v1628_v49 = vmul.f32 2.1237322e-06, %v1627_v23  ;;  %v1639_v28 = vmul.f32 3.8918573e-05, %v1627_v23  ;;  %v1592_v29 = vmul.f32 %v1591_v30, %v1587_v22 }
0x1201   :  { %v1604_v31 = vadd.f32 0.112945676, %v1603_v24  ;;  %v1629_v43 = vadd.f32 0.00028619796, %v1628_v49  ;;  %v1640_v32 = vadd.f32 0.001143296, %v1639_v28 }
0x1202   :  { %v1593_v51 = vadd.f32 0.05243302, %v1592_v29 }
0x1203   :  { %v1605_v36 = vmul.f32 %v1604_v31, %v1587_v22  ;;  %v1630_v35 = vmul.f32 %v1629_v43, %v1627_v23  ;;  %v1641_v37 = vmul.f32 %v1640_v32, %v1627_v23  ;;  %v1582_v43 = vmul.f32 0.5, %v3071_v6 }
0x1204   :  { %v1594_v47 = vmul.f32 %v1593_v51, %v1587_v22  ;;  %v1583_v32 = vmul.f32 0.5, %v3078_v13 }
0x1205   :  { %v1606_v38 = vadd.f32 0.4994258, %v1605_v36  ;;  %v1631_v44 = vadd.f32 0.0036580483, %v1630_v35  ;;  %v1642_v39 = vadd.f32 0.014752088, %v1641_v37 }
0x1206   :  { %v1595_v54 = vadd.f32 0.18741608, %v1594_v47 }
0x1207   :  { %v1607_v40 = vmul.f32 %v1606_v38, %v1587_v22  ;;  %v1643_v42 = vmul.f32 %v1642_v39, %v1627_v23  ;;  %v1632_v45 = vmul.f32 %v1631_v44, %v1627_v23 }
0x1208   :  { %v1596_v33 = vmul.f32 %v1595_v54, %v1587_v22  ;;  %v2089_v54 = vld [vmem:[#allocation21] sm:$0xff] }
0x1209   :  { %v1608_v41 = vadd.f32 1.0, %v1607_v40  ;;  %v1644_v61 = vadd.f32 0.112945676, %v1643_v42  ;;  %v1633_v48 = vadd.f32 0.05243302, %v1632_v45 }
0x120a   :  { %v1597_v63 = vadd.f32 1.1283791, %v1596_v33 }
0x120b   :  { %2232 = vrcp.f32 %v1608_v41  ;;  %v1645_v27 = vmul.f32 %v1644_v61, %v1627_v23  ;;  %v1634_v57 = vmul.f32 %v1633_v48, %v1627_v23  ;;  %v1620_v62 = vand.u32 2147483648, %v1608_v41 }
0x120c   :  { %v1618_v59 = vand.u32 2147483647, %v1608_v41  ;;  %vm1614_vm12 = vweird.f32 %v1608_v41  ;;  %v1598_v11 = vmul.f32 %v1597_v63, %v3074_v7 }
0x120d   :  { %v1646_v50 = vadd.f32 0.4994258, %v1645_v27  ;;  %v1635_v0 = vadd.f32 0.18741608, %v1634_v57  ;;  %v1621_v21 = vor.u32 1.1754944e-38, %v1620_v62 }
0x120e   :  { %vm1619_vm15 = vcmp.eq.f32.partialorder %v1618_v59, 8.507059e+37 }
0x120f   :  { %v1647_v52 = vmul.f32 %v1646_v50, %v1627_v23  ;;  %v1636_v8 = vmul.f32 %v1635_v0, %v1627_v23 }
0x1211   :  { %v2233_v53 = vpop.eup %2232  ;;  %v1648_v58 = vadd.f32 1.0, %v1647_v52  ;;  %v1637_v22 = vadd.f32 1.1283791, %v1636_v8 }
0x1212   :  { %v1610_v55 = vmul.f32 %v2233_v53, %v1608_v41  ;;  %vm1615_vm11 = vweird.f32 %v2233_v53 }
0x1213   :  { %2234 = vrcp.f32 %v1648_v58  ;;  %vm1616_vm14 = vmor %vm1614_vm12, %vm1615_vm11  ;;  %v1660_v15 = vand.u32 2147483648, %v1648_v58  ;;  %v1658_v19 = vand.u32 2147483647, %v1648_v58  ;;  %vm1654_vm2 = vweird.f32 %v1648_v58 }
0x1214   :  { %v1611_v26 = vsub.f32 1.0, %v1610_v55  ;;  %v1638_v49 = vmul.f32 %v1637_v22, %v3081_v16  ;;  %v2138_v16 = vld [vmem:[%s3165_s14 + $0x1] ss:$0 sm:$0xff]  ;;  %vm1848_vm11 = vcmask 7168  }
0x1215   :  { %v1661_v24 = vor.u32 1.1754944e-38, %v1660_v15  ;;  %vm1659_vm4 = vcmp.eq.f32.partialorder %v1658_v19, 8.507059e+37 }
0x1216   :  { %v1612_v60 = vmul.f32 %v2233_v53, %v1611_v26 }
0x1218   :  { %v1613_v1 = vadd.f32 %v2233_v53, %v1612_v60 }
0x1219   :  { %v2235_v4 = vpop.eup %2234 }
0x121a   :  { %v1617_v5 = vsel %vm1616_vm14, %v2233_v53, %v1613_v1  ;;  %v1650_v9 = vmul.f32 %v2235_v4, %v1648_v58  ;;  %vm1655_vm1 = vweird.f32 %v2235_v4  ;;  %vm1922_vm14 = vcmask 1041409  }
0x121b   :  { %v1622_v10 = vsel %vm1619_vm15, %v1621_v21, %v1617_v5  ;;  %vm1656_vm3 = vmor %vm1654_vm2, %vm1655_vm1  ;;  %vm1925_vm15 = vcmask 254976  }
0x121c   :  { %v1651_v14 = vsub.f32 1.0, %v1650_v9  ;;  %v1623_v17 = vmul.f32 %v1622_v10, %v1598_v11  ;;  %v2139_v9 = vld [vmem:[#allocation20 + $0x1] ss:$0 sm:$0xff] }
0x121e   :  { %v1652_v18 = vmul.f32 %v2235_v4, %v1651_v14  ;;  %v2035_v25 = vclamps-f32 %v1623_v17, 1.0  ;;  %v2140_v14 = vld [vmem:[%s3167_s16 + $0x1] ss:$0 sm:$0xff] }
0x1220   :  { %v1653_v20 = vadd.f32 %v2235_v4, %v1652_v18  ;;  %v1666_v31 = vadd.f32 1.0, %v2035_v25 }
0x1222   :  { %v1657_v23 = vsel %vm1656_vm3, %v2235_v4, %v1653_v20  ;;  %v1668_v34 = vmul.f32 %v1666_v31, %v1582_v43 }
0x1223   :  { %v1662_v28 = vsel %vm1659_vm4, %v1661_v24, %v1657_v23  ;;  %v2141_v24 = vld [vmem:[%s3169_s18] ss:$0 sm:$0xff]  ;;  %s3193_s18 = sld [smem:[#allocation32_spill]] }
0x1224   :  { %v1663_v30 = vmul.f32 %v1662_v28, %v1638_v49  ;;  %v2142_v23 = vld [vmem:[%s3170_s19] ss:$0 sm:$0xff] }
0x1226   :  { %v2036_v7 = vclamps-f32 %v1663_v30, 1.0 }
0x1228   :  { %v1667_v36 = vadd.f32 1.0, %v2036_v7 }
0x122a   :  { %v1669_v35 = vmul.f32 %v1667_v36, %v1583_v32  ;;  %v2143_v36 = vld [vmem:[#allocation2] ss:$0 sm:$0xff] }
0x122c   :  { %v1679_v37 = vpack.c.bf16 %v1669_v35, %v1668_v34  ;;  %v1842_v34 = vld [vmem:[%s3193_s18] sm:$0xff] }
0x122d   :  { %vm1844_vm7 = vcmp.gt.f32.partialorder %v1842_v34, 0.0 }
0x122e   :  { %2062 = vmatmul.msk.bf16.vlgmr.msrb.gmra.mxu0 %vm978_vm13, %v1679_v37 }
0x12ab   :  { %v1721_v29 = vpop.f32.mrf.mxu0 }
0x12ac   :  { %v1722_v38 = vadd.f32 %v2138_v16, %v1721_v29 }
0x12ae   :  { %v1726_v44 = vadd.f32 %v1722_v38, %v3064_v2 }
0x12b0   :  { %v1732_v39 = vsel %vm268_vm0, %v1726_v44, 0.0 }
0x12b1   :  { %1733 = vadd.xlane.f32.xlu1 %v1732_v39 }
0x12b3   :  { %v1723_v6 = vpop.f32.mrf.mxu0 }
0x12b4   :  { %v1724_v40 = vadd.f32 %v2138_v16, %v1723_v6 }
0x12b6   :  { %v1727_v13 = vadd.f32 %v1724_v40, %v3066_v3  ;;  %v2090_v3 = vld [vmem:[#allocation21 + $0x8] sm:$0xff] }
0x12b7   :  { %1816 = vmatpush.bf16.msrb.mxu1 %v2090_v3 }
0x12b8   :  { %v1735_v56 = vsel %vm268_vm0, %v1727_v13, 0.0 }
0x12b9   :  { %1736 = vadd.xlane.f32.xlu0 %v1735_v56  ;;  %v2587_v56 = vmov 0  }
0x12ba   :  { %2122 = vset.pattern.permute.xlu0 %v2587_v56  ;;  %2121 = vset.pattern.permute.xlu2 %v2587_v56 }
0x12bb   :  { %1817 = vmatpush.bf16.msrb.mxu1 %v2089_v54 }
0x1324   :  { %v1734_v42 = vpop.xlane.xlu1 %1733 }
0x1325   :  { %v1738_v51 = vmul.f32 %v1734_v42, %v2780_v12 }
0x1327   :  { %v1740_v41 = vsub.f32 %v1726_v44, %v1738_v51  ;;  %v1843_v44 = vld [vmem:[%s3193_s18 + $0x8] sm:$0xff] }
0x1328   :  { %vm1845_vm12 = vcmp.gt.f32.partialorder %v1843_v44, 0.0 }
0x1329   :  { %v1742_v45 = vmul.f32 %v1740_v41, %v1740_v41 }
0x132b   :  { %v1744_v61 = vsel %vm268_vm0, %v1742_v45, 0.0 }
0x132c   :  { %v1737_v46 = vpop.xlane.xlu0 %1736  ;;  %1745 = vadd.xlane.f32.xlu1 %v1744_v61 }
0x132d   :  { %v1739_v2 = vmul.f32 %v1737_v46, %v2780_v12 }
0x132f   :  { %v1741_v27 = vsub.f32 %v1727_v13, %v1739_v2 }
0x1331   :  { %v1743_v47 = vmul.f32 %v1741_v27, %v1741_v27 }
0x1333   :  { %v1747_v48 = vsel %vm268_vm0, %v1743_v47, 0.0 }
0x1334   :  { %1748 = vadd.xlane.f32.xlu2 %v1747_v48 }
0x139f   :  { %v1746_v50 = vpop.xlane.xlu1 %1745 }
0x13a0   :  { %v1750_v52 = vmul.f32 %v1746_v50, %v2780_v12 }
0x13a2   :  { %v1752_v53 = vadd.f32 1e-12, %v1750_v52 }
0x13a4   :  { %2236 = vrsqrt.f32 %v1752_v53  ;;  %vm1760_vm8 = vweird.f32 %v1752_v53 }
0x13a7   :  { %v1749_v55 = vpop.xlane.xlu2 %1748 }
0x13a8   :  { %v1751_v57 = vmul.f32 %v1749_v55, %v2780_v12 }
0x13aa   :  { %v2237_v58 = vpop.eup %2236  ;;  %v1753_v26 = vadd.f32 1e-12, %v1751_v57 }
0x13ab   :  { %v1755_v33 = vmul.f32 %v2237_v58, %v1752_v53  ;;  %vm1761_vm13 = vweird.f32 %v2237_v58 }
0x13ac   :  { %2238 = vrsqrt.f32 %v1753_v26  ;;  %vm1762_vm9 = vmor %vm1760_vm8, %vm1761_vm13  ;;  %vm1770_vm5 = vweird.f32 %v1753_v26 }
0x13ad   :  { %v1756_v60 = vmul.f32 %v2237_v58, %v1755_v33 }
0x13af   :  { %v1757_v62 = vmul.f32 0.5, %v1756_v60 }
0x13b1   :  { %v1758_v0 = vsub.f32 1.5, %v1757_v62 }
0x13b2   :  { %v2239_v59 = vpop.eup %2238 }
0x13b3   :  { %v1759_v1 = vmul.f32 %v2237_v58, %v1758_v0  ;;  %v1765_v63 = vmul.f32 %v2239_v59, %v1753_v26  ;;  %vm1771_vm10 = vweird.f32 %v2239_v59 }
0x13b4   :  { %vm1772_vm6 = vmor %vm1770_vm5, %vm1771_vm10 }
0x13b5   :  { %v1766_v4 = vmul.f32 %v2239_v59, %v1765_v63  ;;  %v1763_v5 = vsel %vm1762_vm9, %v2237_v58, %v1759_v1 }
0x13b6   :  { %v1774_v12 = vmul.f32 %v1763_v5, %v1740_v41 }
0x13b7   :  { %v1767_v21 = vmul.f32 0.5, %v1766_v4 }
0x13b8   :  { %v1779_v22 = vmul.f32 %v2139_v9, %v1774_v12 }
0x13b9   :  { %v1768_v8 = vsub.f32 1.5, %v1767_v21 }
0x13ba   :  { %v3118_v18 = vadd.f32 %v2140_v14, %v1779_v22 }
0x13bb   :  { %v1769_v10 = vmul.f32 %v2239_v59, %v1768_v8 }
0x13bd   :  { %v1773_v11 = vsel %vm1772_vm6, %v2239_v59, %v1769_v10 }
0x13be   :  { %v1775_v15 = vmul.f32 %v1773_v11, %v1741_v27 }
0x13c0   :  { %v1780_v17 = vmul.f32 %v2139_v9, %v1775_v15 }
0x13c2   :  { %v3120_v19 = vadd.f32 %v2140_v14, %v1780_v17 }
0x13c4   :  { %v1790_v20 = vpack.c.bf16 %v3120_v19, %v3118_v18 }
0x13c6   :  { %2072 = vmatmul.msk.bf16.vlgmr.msrb.gmra.mxu1 %vm268_vm0, %v1790_v20 }
0x1443   :  { %v1819_v25 = vpop.f32.mrf.mxu1 }
0x1444   :  { %v1820_v49 = vadd.f32 %v2141_v24, %v1819_v25 }
0x1446   :  { %2240 = vtanh.f32 %v1820_v49 }
0x144b   :  { %v1821_v28 = vpop.f32.mrf.mxu1 }
0x144c   :  { %v2241_v30 = vpop.eup %2240  ;;  %v1822_v31 = vadd.f32 %v2141_v24, %v1821_v28 }
0x144d   :  { %v1830_v7 = vmul.f32 %v2241_v30, %v2142_v23 }
0x144e   :  { %2242 = vtanh.f32 %v1822_v31 }
0x144f   :  { %1832 = vadd.xlane.f32.xlu1 %v1830_v7 }
0x1454   :  { %v2243_v43 = vpop.eup %2242 }
0x1455   :  { %v1831_v32 = vmul.f32 %v2243_v43, %v2142_v23 }
0x1457   :  { %1834 = vadd.xlane.f32.xlu0 %v1831_v32 }
0x14c2   :  { %v1833_v35 = vpop.xlane.xlu1 %1832 }
0x14c3   :  { %v1840_v37 = vadd.f32 %v2143_v36, %v1833_v35 }
0x14c5   :  { %v1846_v16 = vsel %vm1844_vm7, %v1840_v37, -1e+09 }
0x14c6   :  { %v1849_v29 = vsel %vm1848_vm11, %v1846_v16, -inf }
0x14c7   :  { %v1850_v38 = vrot.slane %v1849_v29, 4 }
0x14c9   :  { %v1851_v39 = vmax.f32 %v1849_v29, %v1850_v38 }
0x14ca   :  { %v1835_v6 = vpop.xlane.xlu0 %1834 }
0x14cb   :  { %v1852_v40 = vrot.slane %v1851_v39, 2  ;;  %v1841_v13 = vadd.f32 %v2143_v36, %v1835_v6 }
0x14cd   :  { %v1853_v42 = vmax.f32 %v1851_v39, %v1852_v40  ;;  %v1847_v51 = vsel %vm1845_vm12, %v1841_v13, -1e+09  ;;  %v2145_v39 = vld [vmem:[#allocation3] ss:$0 sm:$0xff] }
0x14ce   :  { %v1856_v41 = vsel %vm1848_vm11, %v1847_v51, -inf }
0x14cf   :  { %v1854_v45 = vrot.slane %v1853_v42, 1  ;;  %v1857_v61 = vrot.slane %v1856_v41, 4 }
0x14d1   :  { %v1855_v46 = vmax.f32 %v1853_v42, %v1854_v45  ;;  %v1858_v2 = vmax.f32 %v1856_v41, %v1857_v61 }
0x14d3   :  { %v1863_v27 = vsub.f32 %v1846_v16, %v1855_v46  ;;  %v1859_v47 = vrot.slane %v1858_v2, 2 }
0x14d5   :  { %v1865_v48 = vmul.f32 1.442695, %v1863_v27  ;;  %v1860_v3 = vmax.f32 %v1858_v2, %v1859_v47 }
0x14d7   :  { %2244 = vpow2.f32 %v1865_v48  ;;  %v1861_v50 = vrot.slane %v1860_v3, 1 }
0x14d9   :  { %v1862_v52 = vmax.f32 %v1860_v3, %v1861_v50 }
0x14db   :  { %v1864_v53 = vsub.f32 %v1847_v51, %v1862_v52 }
0x14dd   :  { %v2245_v54 = vpop.eup %2244  ;;  %v1867_v55 = vmul.f32 1.442695, %v1864_v53 }
0x14de   :  { %v1869_v57 = vsel %vm1848_vm11, %v2245_v54, 0.0 }
0x14df   :  { %v1870_v58 = vrot.slane %v1869_v57, 4  ;;  %2246 = vpow2.f32 %v1867_v55 }
0x14e1   :  { %v1871_v26 = vadd.f32 %v1870_v58, %v1869_v57 }
0x14e3   :  { %v1872_v33 = vrot.slane %v1871_v26, 2 }
0x14e5   :  { %v2247_v60 = vpop.eup %2246  ;;  %v1873_v62 = vadd.f32 %v1872_v33, %v1871_v26 }
0x14e6   :  { %v1876_v0 = vsel %vm1848_vm11, %v2247_v60, 0.0 }
0x14e7   :  { %v1877_v59 = vrot.slane %v1876_v0, 4  ;;  %v1874_v1 = vrot.slane %v1873_v62, 1 }
0x14e9   :  { %v1878_v63 = vadd.f32 %v1877_v59, %v1876_v0  ;;  %v1875_v4 = vadd.f32 %v1874_v1, %v1873_v62 }
0x14eb   :  { %v1879_v5 = vrot.slane %v1878_v63, 2  ;;  %2248 = vrcp.f32 %v1875_v4 }
0x14ed   :  { %v1880_v21 = vadd.f32 %v1879_v5, %v1878_v63 }
0x14ef   :  { %v1881_v8 = vrot.slane %v1880_v21, 1 }
0x14f1   :  { %v2249_v9 = vpop.eup %2248  ;;  %v1882_v12 = vadd.f32 %v1881_v8, %v1880_v21 }
0x14f2   :  { %v1885_v10 = vmul.f32 %v2249_v9, %v2245_v54 }
0x14f3   :  { %2250 = vrcp.f32 %v1882_v12 }
0x14f4   :  { %1889 = vperm.xlu0 %2122, %v1885_v10  }
0x14f9   :  { %v2251_v11 = vpop.eup %2250 }
0x14fa   :  { %v1886_v14 = vmul.f32 %v2251_v11, %v2247_v60 }
0x14fc   :  { %1894 = vperm.xlu2 %2121, %v1886_v14  }
0x1556   :  { %v1895_v22 = vpop.permute.xlu2 %1894 }
0x1557   :  { %v1898_v15 = vmul.f32 %v1895_v22, %v3120_v19  ;;  %v2144_v19 = vld [vmem:[%s3172_s21] ss:$0 sm:$0xff] }
0x1559   :  { %v1906_v17 = vsel %vm268_vm0, %v1898_v15, 0.0 }
0x155a   :  { %v1907_v20 = vrot.slane %v1906_v17, 4 }
0x155c   :  { %v1908_v24 = vadd.f32 %v1907_v20, %v1906_v17 }
0x155e   :  { %v1909_v25 = vrot.slane %v1908_v24, 2 }
0x1560   :  { %v1910_v49 = vadd.f32 %v1909_v25, %v1908_v24 }
0x1562   :  { %v1911_v31 = vrot.slane %v1910_v49, 1 }
0x1564   :  { %v1912_v32 = vadd.f32 %v1911_v31, %v1910_v49 }
0x1566   :  { %v1890_v23 = vpop.permute.xlu0 %1889  ;;  %v1918_v37 = vmul.f32 %v2144_v19, %v1912_v32 }
0x1567   :  { %v1897_v28 = vmul.f32 %v1890_v23, %v3118_v18 }
0x1568   :  { %v1921_v38 = vrot.slane %v1918_v37, 7 }
0x1569   :  { %v1899_v30 = vsel %vm268_vm0, %v1897_v28, 0.0  ;;  %vm1935_vm0 = vcmask 1024  }
0x156a   :  { %v1900_v7 = vrot.slane %v1899_v30, 4 }
0x156c   :  { %v1901_v43 = vadd.f32 %v1900_v7, %v1899_v30 }
0x156e   :  { %v1902_v36 = vrot.slane %v1901_v43, 2 }
0x1570   :  { %v1903_v34 = vadd.f32 %v1902_v36, %v1901_v43 }
0x1572   :  { %v1904_v35 = vrot.slane %v1903_v34, 1 }
0x1574   :  { %v1905_v16 = vadd.f32 %v1904_v35, %v1903_v34 }
0x1576   :  { %v1917_v29 = vmul.f32 %v2144_v19, %v1905_v16 }
0x1578   :  { %v1923_v18 = vsel %vm1922_vm14, %v1921_v38, %v1917_v29 }
0x1579   :  { %v1926_v44 = vsel %vm1925_vm15, %v1923_v18, 0.0 }
0x157a   :  { %1927 = vadd.xlane.f32.xlu1 %v1926_v44 }
0x15ed   :  { %v1928_v6 = vpop.xlane.xlu1 %1927 }
0x15ee   :  { %v1933_v40 = vadd.f32 %v2145_v39, %v1928_v6 }
0x15f0   :  { %2252 = vtanh.f32 %v1933_v40 }
0x15f6   :  { %v2253_v13 = vpop.eup %2252 }
0x15f7   :  { %1936 = vst.msk [vmem:[%s3173_s23] sm:$0x3] %vm1935_vm0, %v2253_v13 }
0x15f8   :  { %1941 = vsyncpa [#allocation5], 1 }
0x15f9   :  { %1942 = vsyncpa [#allocation7], 1 }
0x15fa   :  { %1943 = vsyncpa [#allocation10], 1 }
0x15fb   :  { %1944 = vsyncpa [#allocation13], 1 }
0x15fc   :  { %1945 = vsyncpa [#allocation16], 1 }
0x15fd   :  { %1946 = vsyncpa [#allocation19], 1 }
0x15fe   :  { %1947 = vsyncpa [#allocation22], 1 }

</bundles_post_ra>
